<compile_context>
chip_gen: v6e
topology: v6e:2x2x1
jax: 0.10.0
libtpu: 0.0.40
codegen_flags: <defaults>
</compile_context>

<pallas_src>
import functools

import jax
import jax.numpy as jnp
import numpy as np
from jax.experimental import pallas as pl
from jax.experimental.pallas import tpu as pltpu

EPS = 1e-5                       # nn.BatchNorm1d default eps
VMEM_LIMIT = 32 * 1024 * 1024    # explicit scoped-VMEM budget: > v5e's 16 MiB
                                 # default, safely < v7x's 64 MiB physical.


# ---------------------------------------------------------------------------
# Pass 1: per-tile partial sum / sum-of-squares of x, per channel.
# ---------------------------------------------------------------------------
def _xstats_kernel(x_ref, sum_ref, sumsq_ref):
    x = x_ref[0].astype(jnp.float32)                        # (Cin, TT)
    sum_ref[0, 0] = jnp.sum(x, axis=1, keepdims=True)       # (Cin, 1)
    sumsq_ref[0, 0] = jnp.sum(x * x, axis=1, keepdims=True)  # (Cin, 1)


# ---------------------------------------------------------------------------
# Pass 2: a0 = cos(scale0*x + shift0);  h = W0 @ a0 + b0; emit h and h-stats.
# (scale0/shift0 fold BN0 normalization and the conditional affine into one fma)
# ---------------------------------------------------------------------------
def _fc0_kernel(x_ref, s0_ref, t0_ref, w0_ref, b0_ref,
                h_ref, hsum_ref, hsumsq_ref):
    x = x_ref[0].astype(jnp.float32)                        # (Cin, TT)
    a0 = jnp.cos(s0_ref[0] * x + t0_ref[0])                 # f32 elementwise (v5e-safe)
    h = jnp.dot(w0_ref[...], a0.astype(w0_ref.dtype),       # bf16 MXU, f32 accumulate
                preferred_element_type=jnp.float32) + b0_ref[...]   # (H, TT) f32
    h_ref[0] = h.astype(h_ref.dtype)                        # bf16 HBM intermediate
    # BN1 statistics from the f32 values (before the bf16 cast).
    hsum_ref[0, 0] = jnp.sum(h, axis=1, keepdims=True)      # (H, 1)
    hsumsq_ref[0, 0] = jnp.sum(h * h, axis=1, keepdims=True)


# ---------------------------------------------------------------------------
# Pass 3: a1 = cos(scale1*h + shift1); out = W1 @ a1 + b1 + shortcut(x).
# ---------------------------------------------------------------------------
def _fc1_kernel(*refs, has_shortcut):
    if has_shortcut:
        (h_ref, x_ref, s1_ref, t1_ref, w1_ref, b1_ref, scw_ref, out_ref) = refs
    else:
        (h_ref, x_ref, s1_ref, t1_ref, w1_ref, b1_ref, out_ref) = refs
        scw_ref = None

    h = h_ref[0].astype(jnp.float32)                        # (H, TT)
    a1 = jnp.cos(s1_ref[0] * h + t1_ref[0])                 # f32 elementwise
    dx = jnp.dot(w1_ref[...], a1.astype(w1_ref.dtype),
                 preferred_element_type=jnp.float32) + b1_ref[...]   # (Cout, TT)
    if has_shortcut:
        xs = jnp.dot(scw_ref[...], x_ref[0].astype(scw_ref.dtype),
                     preferred_element_type=jnp.float32)
    else:
        xs = x_ref[0].astype(jnp.float32)
    out_ref[0] = (xs + dx).astype(out_ref.dtype)            # lane-dense (Cout, TT) store


# ---------------------------------------------------------------------------
# Wrapper
# ---------------------------------------------------------------------------
def _pick_tile(T):
    for cand in (512, 256, 128):
        if T % cand == 0:
            return cand
    # TODO(synk): pad + mask the length axis for long, non-128-divisible T;
    # for now fall back to one tile spanning the full length.
    return T


def cresnet_block_conv1d(x, c, params, *, tt=None,
                         h_dtype=jnp.bfloat16, mm_dtype=jnp.bfloat16):
    """x: (B, size_in, T) NCL like nn.Conv1d; c: (B, c_dim) -> (B, size_out, T)."""
    B, Cin, T = x.shape
    H = params["fc0_w"].shape[0]
    Cout = params["fc1_w"].shape[0]
    has_shortcut = "sc_w" in params

    TT = _pick_tile(T) if tt is None else tt
    assert T % TT == 0, "length must be divisible by the T-tile"
    nT = T // TT
    grid = (B, nT)
    n_elems = B * T
    h_bytes = np.dtype(h_dtype).itemsize

    x = x.astype(jnp.float32)
    c = c.astype(jnp.float32)

    cparams = pltpu.CompilerParams(
        dimension_semantics=("parallel", "parallel"),
        vmem_limit_bytes=VMEM_LIMIT)

    # Tiny per-batch conditional affine params (1x1 convs of the latent code c)
    # computed once here instead of per grid step.
    gamma0 = c @ params["g0_w"].T + params["g0_b"]          # (B, Cin)
    beta0 = c @ params["b0_w"].T + params["b0_b"]           # (B, Cin)
    gamma1 = c @ params["g1_w"].T + params["g1_b"]          # (B, H)
    beta1 = c @ params["b1_w"].T + params["b1_b"]           # (B, H)

    # Weights in the W @ X_tile orientation; matmul operands in bf16.
    w0 = params["fc0_w"].astype(mm_dtype)                   # (H, Cin)
    b0 = params["fc0_b"].reshape(H, 1).astype(jnp.float32)
    w1 = params["fc1_w"].astype(mm_dtype)                   # (Cout, H)
    b1 = params["fc1_b"].reshape(Cout, 1).astype(jnp.float32)
    scw = params["sc_w"].astype(mm_dtype) if has_shortcut else None

    x_spec = pl.BlockSpec((1, Cin, TT), lambda b, t: (b, 0, t))
    h_spec = pl.BlockSpec((1, H, TT), lambda b, t: (b, 0, t))
    stat_spec_c = pl.BlockSpec((1, 1, Cin, 1), lambda b, t: (b, t, 0, 0))
    stat_spec_h = pl.BlockSpec((1, 1, H, 1), lambda b, t: (b, t, 0, 0))

    def full(shape):  # whole-array block, stays resident across the grid
        return pl.BlockSpec(shape, lambda b, t: tuple(0 for _ in shape))

    # ---------------- pass 1: global BN0 statistics of x ----------------
    xsum, xsumsq = pl.pallas_call(
        _xstats_kernel,
        grid=grid,
        in_specs=[x_spec],
        out_specs=[stat_spec_c, stat_spec_c],
        out_shape=[jax.ShapeDtypeStruct((B, nT, Cin, 1), jnp.float32)] * 2,
        compiler_params=cparams,
        cost_estimate=pl.CostEstimate(
            flops=3 * n_elems * Cin, transcendentals=0,
            bytes_accessed=4 * n_elems * Cin + 8 * B * nT * Cin),
    )(x)

    mean0 = xsum.sum(axis=(0, 1)) / n_elems                 # (Cin, 1)
    var0 = xsumsq.sum(axis=(0, 1)) / n_elems - mean0 * mean0    # biased var
    inv0 = 1.0 / jnp.sqrt(var0 + EPS)
    scale0 = gamma0[:, :, None] * inv0[None]                # (B, Cin, 1)
    shift0 = beta0[:, :, None] - scale0 * mean0[None]       # (B, Cin, 1)

    # -------- pass 2: fc_0 stage, bf16 h intermediate + BN1 statistics --------
    h, hsum, hsumsq = pl.pallas_call(
        _fc0_kernel,
        grid=grid,
        in_specs=[x_spec,
                  pl.BlockSpec((1, Cin, 1), lambda b, t: (b, 0, 0)),
                  pl.BlockSpec((1, Cin, 1), lambda b, t: (b, 0, 0)),
                  full((H, Cin)), full((H, 1))],
        out_specs=[h_spec, stat_spec_h, stat_spec_h],
        out_shape=[jax.ShapeDtypeStruct((B, H, T), h_dtype),
                   jax.ShapeDtypeStruct((B, nT, H, 1), jnp.float32),
                   jax.ShapeDtypeStruct((B, nT, H, 1), jnp.float32)],
        compiler_params=cparams,
        cost_estimate=pl.CostEstimate(
            flops=2 * n_elems * Cin * H + 2 * n_elems * Cin + 4 * n_elems * H,
            transcendentals=n_elems * Cin,
            bytes_accessed=4 * n_elems * Cin + h_bytes * n_elems * H
                           + 8 * B * nT * H),
    )(x, scale0, shift0, w0, b0)

    mean1 = hsum.sum(axis=(0, 1)) / n_elems                 # (H, 1)
    var1 = hsumsq.sum(axis=(0, 1)) / n_elems - mean1 * mean1
    inv1 = 1.0 / jnp.sqrt(var1 + EPS)
    scale1 = gamma1[:, :, None] * inv1[None]                # (B, H, 1)
    shift1 = beta1[:, :, None] - scale1 * mean1[None]       # (B, H, 1)

    # ---------------- pass 3: fc_1 stage + shortcut ----------------
    in_specs = [h_spec, x_spec,
                pl.BlockSpec((1, H, 1), lambda b, t: (b, 0, 0)),
                pl.BlockSpec((1, H, 1), lambda b, t: (b, 0, 0)),
                full((Cout, H)), full((Cout, 1))]
    args = [h, x, scale1, shift1, w1, b1]
    if has_shortcut:
        in_specs.append(full((Cout, Cin)))
        args.append(scw)

    out = pl.pallas_call(
        functools.partial(_fc1_kernel, has_shortcut=has_shortcut),
        grid=grid,
        in_specs=in_specs,
        out_specs=pl.BlockSpec((1, Cout, TT), lambda b, t: (b, 0, t)),
        out_shape=jax.ShapeDtypeStruct((B, Cout, T), jnp.float32),
        compiler_params=cparams,
        cost_estimate=pl.CostEstimate(
            flops=2 * n_elems * H * Cout
                  + (2 * n_elems * Cin * Cout if has_shortcut else 0)
                  + 3 * n_elems * H + 2 * n_elems * Cout,
            transcendentals=n_elems * H,
            bytes_accessed=h_bytes * n_elems * H + 4 * n_elems * Cin
                           + 4 * n_elems * Cout),
    )(*args)
    return out                                              # (B, size_out, T), NCL


# ---------------------------------------------------------------------------
# Test scaffolding
# ---------------------------------------------------------------------------
def init_params(key, c_dim, size_in, size_h, size_out):
    """Deterministic synthetic parameters (shapes from the module __init__).

    Random values instead of the module's zero-inits (fc_1.weight, conv_gamma/
    beta weights) so every code path is actually exercised.
    """
    ks = jax.random.split(key, 13)

    def w(k, shape, scale=0.3):
        return scale * jax.random.normal(k, shape, dtype=jnp.float32)

    params = dict(
        g0_w=w(ks[0], (size_in, c_dim)), g0_b=w(ks[1], (size_in,)),
        b0_w=w(ks[2], (size_in, c_dim)), b0_b=w(ks[3], (size_in,)),
        fc0_w=w(ks[4], (size_h, size_in)), fc0_b=w(ks[5], (size_h,)),
        g1_w=w(ks[6], (size_h, c_dim)), g1_b=w(ks[7], (size_h,)),
        b1_w=w(ks[8], (size_h, c_dim)), b1_b=w(ks[9], (size_h,)),
        fc1_w=w(ks[10], (size_out, size_h)), fc1_b=w(ks[11], (size_out,)),
    )
    if size_in != size_out:   # shortcut = Conv1d(size_in, size_out, 1, bias=False)
        params["sc_w"] = w(ks[12], (size_out, size_in))
    return params


def reference(x, c, params):
    """Pure-JAX f32 reference with PyTorch NCL semantics (training-mode BN)."""
    def cbn(h, gw, gb, bw, bb):
        gamma = (c @ gw.T + gb)[:, :, None]
        beta = (c @ bw.T + bb)[:, :, None]
        mean = h.mean(axis=(0, 2), keepdims=True)
        var = ((h - mean) ** 2).mean(axis=(0, 2), keepdims=True)
        return gamma * (h - mean) / jnp.sqrt(var + EPS) + beta

    net = jnp.einsum("hc,bct->bht", params["fc0_w"],
                     jnp.cos(cbn(x, params["g0_w"], params["g0_b"],
                                 params["b0_w"], params["b0_b"]))) \
          + params["fc0_b"][None, :, None]
    dx = jnp.einsum("oh,bht->bot", params["fc1_w"],
                    jnp.cos(cbn(net, params["g1_w"], params["g1_b"],
                                params["b1_w"], params["b1_b"]))) \
         + params["fc1_b"][None, :, None]
    x_s = jnp.einsum("oc,bct->bot", params["sc_w"], x) if "sc_w" in params else x
    return x_s + dx


if __name__ == "__main__":
    key = jax.random.PRNGKey(0)

    # Config 1: shortcut path (size_in != size_out), multi-tile grid (2 x 2).
    B, T = 2, 256
    c_dim, size_in, size_h, size_out = 8, 8, 32, 16
    kx, kc, kp, key = jax.random.split(key, 4)
    x = jax.random.normal(kx, (B, size_in, T), dtype=jnp.float32)   # NCL
    c = jax.random.normal(kc, (B, c_dim), dtype=jnp.float32)
    params = init_params(kp, c_dim, size_in, size_h, size_out)

    fwd = jax.jit(functools.partial(cresnet_block_conv1d, tt=128))
    out = jax.block_until_ready(fwd(x, c, params))
    ref = reference(x, c, params)
    # bf16 matmul operands + bf16 h intermediate -> looser tolerance than f32.
    np.testing.assert_allclose(np.asarray(out), np.asarray(ref),
                               rtol=3e-2, atol=3e-2)

    # Config 2: identity shortcut (size_in == size_out), single-tile grid.
    B2, T2 = 2, 16
    c_dim2, size_in2, size_h2, size_out2 = 8, 16, 16, 16
    kx, kc, kp, key = jax.random.split(key, 4)
    x2 = jax.random.normal(kx, (B2, size_in2, T2), dtype=jnp.float32)
    c2 = jax.random.normal(kc, (B2, c_dim2), dtype=jnp.float32)
    params2 = init_params(kp, c_dim2, size_in2, size_h2, size_out2)
    out2 = jax.block_until_ready(jax.jit(cresnet_block_conv1d)(x2, c2, params2))
    ref2 = reference(x2, c2, params2)
    np.testing.assert_allclose(np.asarray(out2), np.asarray(ref2),
                               rtol=3e-2, atol=3e-2)

    print("KERNEL_OK")
</pallas_src>

<mosaic_0001>
module attributes {stable_mosaic.version = 11 : i64} {
  func.func @_xstats_kernel(%arg0: i32, %arg1: i32, %arg2: memref<1x8x128xf32, #tpu.memory_space<vmem>>, %arg3: memref<1x1x8x1xf32, #tpu.memory_space<vmem>>, %arg4: memref<1x1x8x1xf32, #tpu.memory_space<vmem>>) attributes {dimension_semantics = [#tpu.dimension_semantics<parallel>, #tpu.dimension_semantics<parallel>], iteration_bounds = array<i64: 2, 2>, scalar_prefetch = 0 : i64, scratch_operands = 0 : i64, tpu.core_type = #tpu.core_type<tc>, window_params = [{transform_indices = @transform_0, window_bounds = array<i64: 1, 8, 128>}, {transform_indices = @transform_1, window_bounds = array<i64: 1, 1, 8, 1>}, {transform_indices = @transform_2, window_bounds = array<i64: 1, 1, 8, 1>}]} {
    %c0 = arith.constant 0 : index
    %c0_0 = arith.constant 0 : index
    %c0_1 = arith.constant 0 : index
    %0 = vector.load %arg2[%c0, %c0_0, %c0_1] : memref<1x8x128xf32, #tpu.memory_space<vmem>>, vector<1x8x128xf32>
    %1 = vector.shape_cast %0 : vector<1x8x128xf32> to vector<8x128xf32>
    %cst = arith.constant dense<0.000000e+00> : vector<8xf32>
    %2 = vector.multi_reduction <add>, %1, %cst [1] : vector<8x128xf32> to vector<8xf32>
    %3 = vector.shape_cast %2 : vector<8xf32> to vector<8x1xf32>
    %c0_2 = arith.constant 0 : index
    %c0_3 = arith.constant 0 : index
    %c0_4 = arith.constant 0 : index
    %c0_5 = arith.constant 0 : index
    %4 = vector.load %arg3[%c0_2, %c0_3, %c0_4, %c0_5] : memref<1x1x8x1xf32, #tpu.memory_space<vmem>>, vector<1x1x8x1xf32>
    %5 = vector.shape_cast %4 : vector<1x1x8x1xf32> to vector<8x1xf32>
    %6 = vector.shape_cast %3 : vector<8x1xf32> to vector<1x1x8x1xf32>
    tpu.vector_store %arg3[%c0_2, %c0_3, %c0_4, %c0_5], %6 {strides = array<i32>} : memref<1x1x8x1xf32, #tpu.memory_space<vmem>>, vector<1x1x8x1xf32>,
    %7 = arith.mulf %1, %1 : vector<8x128xf32>
    %cst_6 = arith.constant dense<0.000000e+00> : vector<8xf32>
    %8 = vector.multi_reduction <add>, %7, %cst_6 [1] : vector<8x128xf32> to vector<8xf32>
    %9 = vector.shape_cast %8 : vector<8xf32> to vector<8x1xf32>
    %c0_7 = arith.constant 0 : index
    %c0_8 = arith.constant 0 : index
    %c0_9 = arith.constant 0 : index
    %c0_10 = arith.constant 0 : index
    %10 = vector.load %arg4[%c0_7, %c0_8, %c0_9, %c0_10] : memref<1x1x8x1xf32, #tpu.memory_space<vmem>>, vector<1x1x8x1xf32>
    %11 = vector.shape_cast %10 : vector<1x1x8x1xf32> to vector<8x1xf32>
    %12 = vector.shape_cast %9 : vector<8x1xf32> to vector<1x1x8x1xf32>
    tpu.vector_store %arg4[%c0_7, %c0_8, %c0_9, %c0_10], %12 {strides = array<i32>} : memref<1x1x8x1xf32, #tpu.memory_space<vmem>>, vector<1x1x8x1xf32>,
    return
  }
  func.func @transform_0(%arg0: i32, %arg1: i32) -> (i32, i32, i32) {
    %c0_i32 = arith.constant 0 : i32
    %c0_i32_0 = arith.constant 0 : i32
    return %arg0, %c0_i32, %arg1 : i32, i32, i32
  }
  func.func @transform_1(%arg0: i32, %arg1: i32) -> (i32, i32, i32, i32) {
    %c0_i32 = arith.constant 0 : i32
    %c0_i32_0 = arith.constant 0 : i32
    %c0_i32_1 = arith.constant 0 : i32
    return %arg0, %arg1, %c0_i32, %c0_i32_0 : i32, i32, i32, i32
  }
  func.func @transform_2(%arg0: i32, %arg1: i32) -> (i32, i32, i32, i32) {
    %c0_i32 = arith.constant 0 : i32
    %c0_i32_0 = arith.constant 0 : i32
    %c0_i32_1 = arith.constant 0 : i32
    return %arg0, %arg1, %c0_i32, %c0_i32_0 : i32, i32, i32, i32
  }
}

module attributes {stable_mosaic.version = 11 : i64} {
  func.func @_fc0_kernel(%arg0: i32, %arg1: i32, %arg2: memref<1x8x128xf32, #tpu.memory_space<vmem>>, %arg3: memref<1x8x1xf32, #tpu.memory_space<vmem>>, %arg4: memref<1x8x1xf32, #tpu.memory_space<vmem>>, %arg5: memref<32x8xbf16, #tpu.memory_space<vmem>>, %arg6: memref<32x1xf32, #tpu.memory_space<vmem>>, %arg7: memref<1x32x128xbf16, #tpu.memory_space<vmem>>, %arg8: memref<1x1x32x1xf32, #tpu.memory_space<vmem>>, %arg9: memref<1x1x32x1xf32, #tpu.memory_space<vmem>>) attributes {dimension_semantics = [#tpu.dimension_semantics<parallel>, #tpu.dimension_semantics<parallel>], iteration_bounds = array<i64: 2, 2>, scalar_prefetch = 0 : i64, scratch_operands = 0 : i64, tpu.core_type = #tpu.core_type<tc>, window_params = [{transform_indices = @transform_0, window_bounds = array<i64: 1, 8, 128>}, {transform_indices = @transform_1, window_bounds = array<i64: 1, 8, 1>}, {transform_indices = @transform_2, window_bounds = array<i64: 1, 8, 1>}, {pipeline_mode = #tpu.pipeline_mode<synchronous>, transform_indices = @transform_3, window_bounds = array<i64: 32, 8>}, {pipeline_mode = #tpu.pipeline_mode<synchronous>, transform_indices = @transform_4, window_bounds = array<i64: 32, 1>}, {transform_indices = @transform_5, window_bounds = array<i64: 1, 32, 128>}, {transform_indices = @transform_6, window_bounds = array<i64: 1, 1, 32, 1>}, {transform_indices = @transform_7, window_bounds = array<i64: 1, 1, 32, 1>}]} {
    %c0 = arith.constant 0 : index
    %c0_0 = arith.constant 0 : index
    %c0_1 = arith.constant 0 : index
    %0 = vector.load %arg2[%c0, %c0_0, %c0_1] : memref<1x8x128xf32, #tpu.memory_space<vmem>>, vector<1x8x128xf32>
    %1 = vector.shape_cast %0 : vector<1x8x128xf32> to vector<8x128xf32>
    %c0_2 = arith.constant 0 : index
    %c0_3 = arith.constant 0 : index
    %c0_4 = arith.constant 0 : index
    %2 = vector.load %arg3[%c0_2, %c0_3, %c0_4] : memref<1x8x1xf32, #tpu.memory_space<vmem>>, vector<1x8x1xf32>
    %3 = vector.shape_cast %2 : vector<1x8x1xf32> to vector<8x1xf32>
    %4 = vector.broadcast %3 : vector<8x1xf32> to vector<8x128xf32>
    %5 = arith.mulf %4, %1 : vector<8x128xf32>
    %c0_5 = arith.constant 0 : index
    %c0_6 = arith.constant 0 : index
    %c0_7 = arith.constant 0 : index
    %6 = vector.load %arg4[%c0_5, %c0_6, %c0_7] : memref<1x8x1xf32, #tpu.memory_space<vmem>>, vector<1x8x1xf32>
    %7 = vector.shape_cast %6 : vector<1x8x1xf32> to vector<8x1xf32>
    %8 = vector.broadcast %7 : vector<8x1xf32> to vector<8x128xf32>
    %9 = arith.addf %5, %8 : vector<8x128xf32>
    %10 = math.cos %9 : vector<8x128xf32>
    %c0_8 = arith.constant 0 : index
    %c0_9 = arith.constant 0 : index
    %11 = vector.load %arg5[%c0_8, %c0_9] : memref<32x8xbf16, #tpu.memory_space<vmem>>, vector<32x8xbf16>
    %12 = arith.truncf %10 : vector<8x128xf32> to vector<8x128xbf16>
    %cst = arith.constant dense<0.000000e+00> : vector<32x128xf32>
    %13 = tpu.matmul %11, %12, %cst {dimension_numbers = #tpu.dot_dimension_numbers<[1], [0], [0], [1], [0, 0, 1, 1], [], []>} : vector<32x8xbf16>, vector<8x128xbf16>, vector<32x128xf32> -> vector<32x128xf32>
    %c0_10 = arith.constant 0 : index
    %c0_11 = arith.constant 0 : index
    %14 = vector.load %arg6[%c0_10, %c0_11] : memref<32x1xf32, #tpu.memory_space<vmem>>, vector<32x1xf32>
    %15 = vector.broadcast %14 : vector<32x1xf32> to vector<32x128xf32>
    %16 = arith.addf %13, %15 : vector<32x128xf32>
    %17 = arith.truncf %16 : vector<32x128xf32> to vector<32x128xbf16>
    %c0_12 = arith.constant 0 : index
    %c0_13 = arith.constant 0 : index
    %c0_14 = arith.constant 0 : index
    %18 = vector.load %arg7[%c0_12, %c0_13, %c0_14] : memref<1x32x128xbf16, #tpu.memory_space<vmem>>, vector<1x32x128xbf16>
    %19 = vector.shape_cast %18 : vector<1x32x128xbf16> to vector<32x128xbf16>
    %20 = vector.shape_cast %17 : vector<32x128xbf16> to vector<1x32x128xbf16>
    tpu.vector_store %arg7[%c0_12, %c0_13, %c0_14], %20 {strides = array<i32>} : memref<1x32x128xbf16, #tpu.memory_space<vmem>>, vector<1x32x128xbf16>,
    %cst_15 = arith.constant dense<0.000000e+00> : vector<32xf32>
    %21 = vector.multi_reduction <add>, %16, %cst_15 [1] : vector<32x128xf32> to vector<32xf32>
    %22 = vector.shape_cast %21 : vector<32xf32> to vector<32x1xf32>
    %c0_16 = arith.constant 0 : index
    %c0_17 = arith.constant 0 : index
    %c0_18 = arith.constant 0 : index
    %c0_19 = arith.constant 0 : index
    %23 = vector.load %arg8[%c0_16, %c0_17, %c0_18, %c0_19] : memref<1x1x32x1xf32, #tpu.memory_space<vmem>>, vector<1x1x32x1xf32>
    %24 = vector.shape_cast %23 : vector<1x1x32x1xf32> to vector<32x1xf32>
    %25 = vector.shape_cast %22 : vector<32x1xf32> to vector<1x1x32x1xf32>
    tpu.vector_store %arg8[%c0_16, %c0_17, %c0_18, %c0_19], %25 {strides = array<i32>} : memref<1x1x32x1xf32, #tpu.memory_space<vmem>>, vector<1x1x32x1xf32>,
    %26 = arith.mulf %16, %16 : vector<32x128xf32>
    %cst_20 = arith.constant dense<0.000000e+00> : vector<32xf32>
    %27 = vector.multi_reduction <add>, %26, %cst_20 [1] : vector<32x128xf32> to vector<32xf32>
    %28 = vector.shape_cast %27 : vector<32xf32> to vector<32x1xf32>
    %c0_21 = arith.constant 0 : index
    %c0_22 = arith.constant 0 : index
    %c0_23 = arith.constant 0 : index
    %c0_24 = arith.constant 0 : index
    %29 = vector.load %arg9[%c0_21, %c0_22, %c0_23, %c0_24] : memref<1x1x32x1xf32, #tpu.memory_space<vmem>>, vector<1x1x32x1xf32>
    %30 = vector.shape_cast %29 : vector<1x1x32x1xf32> to vector<32x1xf32>
    %31 = vector.shape_cast %28 : vector<32x1xf32> to vector<1x1x32x1xf32>
    tpu.vector_store %arg9[%c0_21, %c0_22, %c0_23, %c0_24], %31 {strides = array<i32>} : memref<1x1x32x1xf32, #tpu.memory_space<vmem>>, vector<1x1x32x1xf32>,
    return
  }
  func.func @transform_0(%arg0: i32, %arg1: i32) -> (i32, i32, i32) {
    %c0_i32 = arith.constant 0 : i32
    %c0_i32_0 = arith.constant 0 : i32
    return %arg0, %c0_i32, %arg1 : i32, i32, i32
  }
  func.func @transform_1(%arg0: i32, %arg1: i32) -> (i32, i32, i32) {
    %c0_i32 = arith.constant 0 : i32
    %c0_i32_0 = arith.constant 0 : i32
    %c0_i32_1 = arith.constant 0 : i32
    return %arg0, %c0_i32, %c0_i32_0 : i32, i32, i32
  }
  func.func @transform_2(%arg0: i32, %arg1: i32) -> (i32, i32, i32) {
    %c0_i32 = arith.constant 0 : i32
    %c0_i32_0 = arith.constant 0 : i32
    %c0_i32_1 = arith.constant 0 : i32
    return %arg0, %c0_i32, %c0_i32_0 : i32, i32, i32
  }
  func.func @transform_3(%arg0: i32, %arg1: i32) -> (i32, i32) {
    %c0_i32 = arith.constant 0 : i32
    %c0_i32_0 = arith.constant 0 : i32
    %c0_i32_1 = arith.constant 0 : i32
    return %c0_i32, %c0_i32_0 : i32, i32
  }
  func.func @transform_4(%arg0: i32, %arg1: i32) -> (i32, i32) {
    %c0_i32 = arith.constant 0 : i32
    %c0_i32_0 = arith.constant 0 : i32
    %c0_i32_1 = arith.constant 0 : i32
    return %c0_i32, %c0_i32_0 : i32, i32
  }
  func.func @transform_5(%arg0: i32, %arg1: i32) -> (i32, i32, i32) {
    %c0_i32 = arith.constant 0 : i32
    %c0_i32_0 = arith.constant 0 : i32
    return %arg0, %c0_i32, %arg1 : i32, i32, i32
  }
  func.func @transform_6(%arg0: i32, %arg1: i32) -> (i32, i32, i32, i32) {
    %c0_i32 = arith.constant 0 : i32
    %c0_i32_0 = arith.constant 0 : i32
    %c0_i32_1 = arith.constant 0 : i32
    return %arg0, %arg1, %c0_i32, %c0_i32_0 : i32, i32, i32, i32
  }
  func.func @transform_7(%arg0: i32, %arg1: i32) -> (i32, i32, i32, i32) {
    %c0_i32 = arith.constant 0 : i32
    %c0_i32_0 = arith.constant 0 : i32
    %c0_i32_1 = arith.constant 0 : i32
    return %arg0, %arg1, %c0_i32, %c0_i32_0 : i32, i32, i32, i32
  }
}

module attributes {stable_mosaic.version = 11 : i64} {
  func.func @_fc1_kernel(%arg0: i32, %arg1: i32, %arg2: memref<1x32x128xbf16, #tpu.memory_space<vmem>>, %arg3: memref<1x8x128xf32, #tpu.memory_space<vmem>>, %arg4: memref<1x32x1xf32, #tpu.memory_space<vmem>>, %arg5: memref<1x32x1xf32, #tpu.memory_space<vmem>>, %arg6: memref<16x32xbf16, #tpu.memory_space<vmem>>, %arg7: memref<16x1xf32, #tpu.memory_space<vmem>>, %arg8: memref<16x8xbf16, #tpu.memory_space<vmem>>, %arg9: memref<1x16x128xf32, #tpu.memory_space<vmem>>) attributes {dimension_semantics = [#tpu.dimension_semantics<parallel>, #tpu.dimension_semantics<parallel>], iteration_bounds = array<i64: 2, 2>, scalar_prefetch = 0 : i64, scratch_operands = 0 : i64, tpu.core_type = #tpu.core_type<tc>, window_params = [{transform_indices = @transform_0, window_bounds = array<i64: 1, 32, 128>}, {transform_indices = @transform_1, window_bounds = array<i64: 1, 8, 128>}, {transform_indices = @transform_2, window_bounds = array<i64: 1, 32, 1>}, {transform_indices = @transform_3, window_bounds = array<i64: 1, 32, 1>}, {pipeline_mode = #tpu.pipeline_mode<synchronous>, transform_indices = @transform_4, window_bounds = array<i64: 16, 32>}, {pipeline_mode = #tpu.pipeline_mode<synchronous>, transform_indices = @transform_5, window_bounds = array<i64: 16, 1>}, {pipeline_mode = #tpu.pipeline_mode<synchronous>, transform_indices = @transform_6, window_bounds = array<i64: 16, 8>}, {transform_indices = @transform_7, window_bounds = array<i64: 1, 16, 128>}]} {
    %c0 = arith.constant 0 : index
    %c0_0 = arith.constant 0 : index
    %c0_1 = arith.constant 0 : index
    %0 = vector.load %arg2[%c0, %c0_0, %c0_1] : memref<1x32x128xbf16, #tpu.memory_space<vmem>>, vector<1x32x128xbf16>
    %1 = vector.shape_cast %0 : vector<1x32x128xbf16> to vector<32x128xbf16>
    %2 = arith.extf %1 : vector<32x128xbf16> to vector<32x128xf32>
    %c0_2 = arith.constant 0 : index
    %c0_3 = arith.constant 0 : index
    %c0_4 = arith.constant 0 : index
    %3 = vector.load %arg4[%c0_2, %c0_3, %c0_4] : memref<1x32x1xf32, #tpu.memory_space<vmem>>, vector<1x32x1xf32>
    %4 = vector.shape_cast %3 : vector<1x32x1xf32> to vector<32x1xf32>
    %5 = vector.broadcast %4 : vector<32x1xf32> to vector<32x128xf32>
    %6 = arith.mulf %5, %2 : vector<32x128xf32>
    %c0_5 = arith.constant 0 : index
    %c0_6 = arith.constant 0 : index
    %c0_7 = arith.constant 0 : index
    %7 = vector.load %arg5[%c0_5, %c0_6, %c0_7] : memref<1x32x1xf32, #tpu.memory_space<vmem>>, vector<1x32x1xf32>
    %8 = vector.shape_cast %7 : vector<1x32x1xf32> to vector<32x1xf32>
    %9 = vector.broadcast %8 : vector<32x1xf32> to vector<32x128xf32>
    %10 = arith.addf %6, %9 : vector<32x128xf32>
    %11 = math.cos %10 : vector<32x128xf32>
    %c0_8 = arith.constant 0 : index
    %c0_9 = arith.constant 0 : index
    %12 = vector.load %arg6[%c0_8, %c0_9] : memref<16x32xbf16, #tpu.memory_space<vmem>>, vector<16x32xbf16>
    %13 = arith.truncf %11 : vector<32x128xf32> to vector<32x128xbf16>
    %cst = arith.constant dense<0.000000e+00> : vector<16x128xf32>
    %14 = tpu.matmul %12, %13, %cst {dimension_numbers = #tpu.dot_dimension_numbers<[1], [0], [0], [1], [0, 0, 1, 1], [], []>} : vector<16x32xbf16>, vector<32x128xbf16>, vector<16x128xf32> -> vector<16x128xf32>
    %c0_10 = arith.constant 0 : index
    %c0_11 = arith.constant 0 : index
    %15 = vector.load %arg7[%c0_10, %c0_11] : memref<16x1xf32, #tpu.memory_space<vmem>>, vector<16x1xf32>
    %16 = vector.broadcast %15 : vector<16x1xf32> to vector<16x128xf32>
    %17 = arith.addf %14, %16 : vector<16x128xf32>
    %c0_12 = arith.constant 0 : index
    %c0_13 = arith.constant 0 : index
    %18 = vector.load %arg8[%c0_12, %c0_13] : memref<16x8xbf16, #tpu.memory_space<vmem>>, vector<16x8xbf16>
    %c0_14 = arith.constant 0 : index
    %c0_15 = arith.constant 0 : index
    %c0_16 = arith.constant 0 : index
    %19 = vector.load %arg3[%c0_14, %c0_15, %c0_16] : memref<1x8x128xf32, #tpu.memory_space<vmem>>, vector<1x8x128xf32>
    %20 = vector.shape_cast %19 : vector<1x8x128xf32> to vector<8x128xf32>
    %21 = arith.truncf %20 : vector<8x128xf32> to vector<8x128xbf16>
    %cst_17 = arith.constant dense<0.000000e+00> : vector<16x128xf32>
    %22 = tpu.matmul %18, %21, %cst_17 {dimension_numbers = #tpu.dot_dimension_numbers<[1], [0], [0], [1], [0, 0, 1, 1], [], []>} : vector<16x8xbf16>, vector<8x128xbf16>, vector<16x128xf32> -> vector<16x128xf32>
    %23 = arith.addf %22, %17 : vector<16x128xf32>
    %c0_18 = arith.constant 0 : index
    %c0_19 = arith.constant 0 : index
    %c0_20 = arith.constant 0 : index
    %24 = vector.load %arg9[%c0_18, %c0_19, %c0_20] : memref<1x16x128xf32, #tpu.memory_space<vmem>>, vector<1x16x128xf32>
    %25 = vector.shape_cast %24 : vector<1x16x128xf32> to vector<16x128xf32>
    %26 = vector.shape_cast %23 : vector<16x128xf32> to vector<1x16x128xf32>
    tpu.vector_store %arg9[%c0_18, %c0_19, %c0_20], %26 {strides = array<i32>} : memref<1x16x128xf32, #tpu.memory_space<vmem>>, vector<1x16x128xf32>,
    return
  }
  func.func @transform_0(%arg0: i32, %arg1: i32) -> (i32, i32, i32) {
    %c0_i32 = arith.constant 0 : i32
    %c0_i32_0 = arith.constant 0 : i32
    return %arg0, %c0_i32, %arg1 : i32, i32, i32
  }
  func.func @transform_1(%arg0: i32, %arg1: i32) -> (i32, i32, i32) {
    %c0_i32 = arith.constant 0 : i32
    %c0_i32_0 = arith.constant 0 : i32
    return %arg0, %c0_i32, %arg1 : i32, i32, i32
  }
  func.func @transform_2(%arg0: i32, %arg1: i32) -> (i32, i32, i32) {
    %c0_i32 = arith.constant 0 : i32
    %c0_i32_0 = arith.constant 0 : i32
    %c0_i32_1 = arith.constant 0 : i32
    return %arg0, %c0_i32, %c0_i32_0 : i32, i32, i32
  }
  func.func @transform_3(%arg0: i32, %arg1: i32) -> (i32, i32, i32) {
    %c0_i32 = arith.constant 0 : i32
    %c0_i32_0 = arith.constant 0 : i32
    %c0_i32_1 = arith.constant 0 : i32
    return %arg0, %c0_i32, %c0_i32_0 : i32, i32, i32
  }
  func.func @transform_4(%arg0: i32, %arg1: i32) -> (i32, i32) {
    %c0_i32 = arith.constant 0 : i32
    %c0_i32_0 = arith.constant 0 : i32
    %c0_i32_1 = arith.constant 0 : i32
    return %c0_i32, %c0_i32_0 : i32, i32
  }
  func.func @transform_5(%arg0: i32, %arg1: i32) -> (i32, i32) {
    %c0_i32 = arith.constant 0 : i32
    %c0_i32_0 = arith.constant 0 : i32
    %c0_i32_1 = arith.constant 0 : i32
    return %c0_i32, %c0_i32_0 : i32, i32
  }
  func.func @transform_6(%arg0: i32, %arg1: i32) -> (i32, i32) {
    %c0_i32 = arith.constant 0 : i32
    %c0_i32_0 = arith.constant 0 : i32
    %c0_i32_1 = arith.constant 0 : i32
    return %c0_i32, %c0_i32_0 : i32, i32
  }
  func.func @transform_7(%arg0: i32, %arg1: i32) -> (i32, i32, i32) {
    %c0_i32 = arith.constant 0 : i32
    %c0_i32_0 = arith.constant 0 : i32
    return %arg0, %c0_i32, %arg1 : i32, i32, i32
  }
}

</mosaic_0001>

<bundles_post_ra>
// kernel: cresnet_block_conv1d.3
= control target key start
LH: loop header
LB: loop body
LE: loop exit
PB: predicated region body
PF: predicated region fallthrough
CT: control target
= control target key end

     0   :  { %8 = vsyncpa [#allocation3], 0  ;;  %s684_s0 = inlined_call_operand.hbm [shape: f32[2,8,256], index: 0, kind: input, shape index: {}]   ;;  %s685_s1 = inlined_call_operand.vmem [shape: f32[2,2,8,1], index: 1, kind: output, shape index: {0}]   ;;  %s686_s2 = inlined_call_operand.vmem [shape: f32[2,2,8,1], index: 2, kind: output, shape index: {1}]  }
   0x1   :  { %10 = vsyncpa [#allocation3 + $0x1], 0  ;;  %s554_s9 = smov 0   ;;  %s556_s10 = smov 0  }
   0x2   :  { %s558_s11 = smov 0   ;;  %s560_s12 = smov 0  }
   0x3   :  { %s562_s13 = smov 0   ;;  %s564_s14 = smov 0  }
   0x4   :  { %s566_s15 = smov 0   ;;  %s568_s16 = smov 0  }
   0x5 LB: > { %s356_s17 = sadd.s32 4294967295, %s536_s16   ;;  %s25_s18 = sadd.s32 1, %s528_s14  ;;  %s536_s16 = sphi %s568_s16, %s16_s16   ;;  %s532_s15 = sphi %s566_s15, %s696_s15   ;;  %s528_s14 = sphi %s564_s14, %s695_s14   ;;  %s524_s13 = sphi %s562_s13, %s694_s13   ;;  %s520_s12 = sphi %s560_s12, %s693_s12   ;;  %s516_s11 = sphi %s558_s11, %s692_s11   ;;  %s512_s10 = sphi %s556_s10, %s691_s10   ;;  %s508_s9 = sphi %s554_s9, %s690_s9  }
   0x6   : > { %p26_p0 = scmp.ge.s32.totalorder %s25_s18, 2  ;;  %s28_s19 = sadd.s32 1, %s532_s15 }
   0x7   : > { %s37_s20 = sadd.s32 1, %s516_s11  ;;  %p44_p1 = scmp.ne.s32.totalorder %s516_s11, %s512_s10 }
   0x8   : > { %s698_s18 = smov (%p26_p0, %s25_s18), 0  ;;  %s700_s19 = smov (!%p26_p0, %s28_s19), %s532_s15 }
   0x9   : > { %s33_s21 = ssub.s32 %s528_s14, %s698_s18  ;;  %p45_p2 = scmp.eq.s32.totalorder %s536_s16, 0 }
   0xa   : > { %p30_p3 = scmp.ge.s32.totalorder %s700_s19, 2  ;;  %p50_p4 = scmp.ne.s32.totalorder %s512_s10, %s508_s9 }
   0xb   : > { %p605_p5 = por %p45_p2, %p44_p1  ;;  %p51_p6 = scmp.eq.s32.totalorder %s356_s17, 0 }
   0xc   : > { %s702_s19 = smov (%p30_p3, %s700_s19), 0  ;;  %p377_p8 = scmp.lt.s32.totalorder %s536_s16, 4 }
   0xd   : > { %p611_p7 = por %p51_p6, %p50_p4  ;;  %s32_s24 = ssub.s32 %s532_s15, %s702_s19 }
   0xe   : > { %s34_s25 = sor.u32 %s33_s21, %s32_s24  ;;  %s130_s26 = sand.u32 1, %s516_s11  }
   0xf   : > { %p35_p9 = scmp.eq.s32.totalorder %s34_s25, 0  ;;  %s360_s27 = sshll.u32 %s130_s26, 3 }
  0x10   : > { %s361_s28 = sshll.u32 %s532_s15, 1  ;;  %s134_s4 = scalar_lea.vmem [#allocation2], %s360_s27 }
  0x11   : > { %s621_s29 = scalar_select %p35_p9, %s516_s11, %s37_s20  }
  0x12   : > { %s139_s30 = sadd.s32 %s528_s14, %s361_s28  ;;  %s143_s5 = sshll.u32 %s134_s4, 4  ;;  %s144_s5 = int_to_ptr.vmem [resolvable:$true] %s143_s5 }
  0x13   : > { %s362_s3 = sshll.u32 %s139_s30, 7  ;;  %p631_p10 = pnand %p377_p8, %p605_p5 }
  0x14   : > { %s141_s8 = scalar_lea.hbm %s684_s0, %s362_s3  ;;  %p363_p11 = scmp.ge.s32.totalorder %s536_s16, 1 }
  0x15   : > { %p148_p12 = scmp.lt.s32.totalorder %s536_s16, 5  ;;  %s131_s17 = scalar_lea.sflag [#allocation3], %s130_s26 }
  0x16   : > { %p444_p13 = pneg %p631_p10  ;;  %s455_s20 = scalar_lea.vmem %s144_s5, 128 }
  0x17   : > { %p456_p0 = scmp.ne.s32.totalorder %s144_s5, %s455_s20  ;;  %s538_s21 = smov [#allocation2]  }
  0x18   : > { %s460_s24 = sshll.u32 %s538_s21, 4  ;;  %s461_s24 = int_to_ptr.vmem [resolvable:$false] %s460_s24 }
  0x19   : > { %p458_p1 = pnand %p456_p0, %p444_p13  ;;  %s462_s25 = scalar_lea.vmem %s461_s24, 256 }
  0x1a   : > { %p463_p3 = scmp.lt.s32.totalorder %s144_s5, %s461_s24  ;;  %p464_p4 = scmp.lt.s32.totalorder %s462_s25, %s455_s20 }
  0x1b   : > { %p459_p2 = pneg %p458_p1 }
  0x1c   : > { %p465_p5 = por %p464_p4, %p463_p3 }
  0x1e   : > { %p466_p6 = pnand %p465_p5, %p459_p2 }
  0x20   : > { %469 = shalt.err (!%p466_p6)
}
  0x21   : > { %376 = dma.hbm_to_vmem [thread:$0]  (!%p631_p10), %s141_s8, 128, %s144_s5, %s131_s17  }
  0x22   : > { %p149_p8 = pnand %p363_p11, %p148_p12 }
  0x23   : > { %s154_s22 = sand.u32 (!%p149_p8), 1, %s512_s10  }
  0x24   : > { %152 = sbr.rel (%p149_p8) target bundleno = 186 (0xba), region = 24  ;;  %s364_s26 = sshll.u32 (!%p149_p8), %s154_s22, 3 }
  0x25   : > { %s155_s27 = scalar_lea.sflag (!%p149_p8), [#allocation3], %s154_s22  ;;  %s158_s28 = scalar_lea.vmem (!%p149_p8), [#allocation2], %s364_s26 }
  0x29   : > { %503 = dma.done.wait (%p611_p7), %s155_s27, 128  }
  0x2a   : > { %505 = vsyncadd (%p611_p7), %s155_s27, 4294967168  ;;  %v206_v0 = vld [vmem:[%s158_s28] sm:$0xff]  ;;  %p190_p9 = scmp.lt.s32.totalorder %s524_s13, 1  ;;  %p192_p10 = scmp.lt.s32.totalorder %s520_s12, 1  ;;  %vm209_vm0 = vcmask 7168  }
  0x2b   : > { %207 = vadd.xlane.f32.xlu0 %v206_v0  ;;  %v211_v1 = vmul.f32 %v206_v0, %v206_v0 }
  0x2c   : > { %s704_s13 = smov (!%p190_p9, %s524_s13), 1  ;;  %s706_s12 = smov (!%p192_p10, %s520_s12), 1 }
  0x2d   : > { %s365_s30 = sshll.u32 %s704_s13, 1 }
  0x2e   : > { %s195_s3 = sadd.s32 %s365_s30, %s706_s12 }
  0x2f   : > { %212 = vadd.xlane.f32.xlu0 %v211_v1  ;;  %s366_s4 = sshll.u32 %s195_s3, 3 }
  0x30   : > { %s197_s23 = scalar_lea.vmem %s685_s1, %s366_s4  ;;  %s205_s9 = scalar_lea.vmem %s686_s2, %s366_s4 }
  0xb4   : > { %v208_v2 = vpop.xlane.xlu0 %207 }
  0xb5   : > { %210 = vst.msk [vmem:[%s197_s23] sm:$0xff] %vm209_vm0, %v208_v2 }
  0xb8   : > { %v213_v3 = vpop.xlane.xlu0 %212 }
  0xb9   : > { %214 = vst.msk [vmem:[%s205_s9] sm:$0xff] %vm209_vm0, %v213_v3 }
  0xba PF: > { %s16_s16 = sadd.s32 1, %s536_s16   ;;  %s690_s9 = smov %s512_s10 }
  0xbb   : > { %p13_p7 = scmp.ge.s32.totalorder %s16_s16, 6   ;;  %s691_s10 = smov %s516_s11 }
  0xbc   : > { %s692_s11 = smov %s621_s29  ;;  %s693_s12 = smov %s528_s14 }
  0xbd   : > { %s694_s13 = smov %s532_s15  ;;  %s695_s14 = smov %s698_s18 }
  0xbe   : > { %s696_s15 = smov %s702_s19  ;;  %15 = sbr.rel (!%p13_p7) target bundleno = 5 (0x5), region = 76 }
  0xc3   :  { %264 = vsyncpa [#allocation3], 1 }
  0xc4   :  { %266 = vsyncpa [#allocation3 + $0x1], 1 }

// kernel: cresnet_block_conv1d.5
= control target key start
LH: loop header
LB: loop body
LE: loop exit
PB: predicated region body
PF: predicated region fallthrough
CT: control target
= control target key end

     0   :  { %12 = vsyncpa [#allocation4], 0  ;;  %s2054_s0 = inlined_call_operand.vmem [shape: bf16[2,32,256], index: 0, kind: input, shape index: {}]   ;;  %s2055_s1 = inlined_call_operand.vmem [shape: f32[2,8,256], index: 1, kind: input, shape index: {}]   ;;  %s2056_s2 = inlined_call_operand.vmem [shape: f32[2,32,1], index: 2, kind: input, shape index: {}]   ;;  %s2057_s3 = inlined_call_operand.vmem [shape: f32[2,32,1], index: 3, kind: input, shape index: {}]   ;;  %s2058_s4 = inlined_call_operand.vmem [shape: bf16[16,32], index: 4, kind: input, shape index: {}]   ;;  %s2059_s5 = inlined_call_operand.vmem [shape: f32[16,1], index: 5, kind: input, shape index: {}]   ;;  %s2060_s6 = inlined_call_operand.vmem [shape: bf16[16,8], index: 6, kind: input, shape index: {}]   ;;  %s2061_s7 = inlined_call_operand.hbm [shape: f32[2,16,256], index: 7, kind: output, shape index: {}]  }
   0x1   :  { %14 = vsyncpa [#allocation4 + $0x1], 0  ;;  %s1501_s24 = smov 0   ;;  %s1503_s25 = smov 0  }
   0x2   :  { %s1505_s26 = smov 0   ;;  %s1507_s27 = smov 0  }
   0x3   :  { %s1509_s28 = smov 0   ;;  %s1511_s29 = smov 0  }
   0x4   :  { %s1513_s30 = smov 0   ;;  %s1515_s8 = smov 0  }
   0x5 LB: > { %s1164_s9 = sadd.s32 4294967295, %s1446_s8   ;;  %s1165_s10 = sadd.s32 4294967294, %s1446_s8   ;;  %s1446_s8 = sphi %s1515_s8, %s20_s8   ;;  %s1442_s30 = sphi %s1513_s30, %s2082_s30   ;;  %s1438_s29 = sphi %s1511_s29, %s2081_s29   ;;  %s1434_s28 = sphi %s1509_s28, %s2080_s28   ;;  %s1430_s27 = sphi %s1507_s27, %s2079_s27   ;;  %s1426_s26 = sphi %s1505_s26, %s2078_s26   ;;  %s1422_s25 = sphi %s1503_s25, %s2077_s25   ;;  %s1418_s24 = sphi %s1501_s24, %s2076_s24  }
   0x6   : > { %s29_s11 = sadd.s32 1, %s1438_s29  ;;  %s32_s12 = sadd.s32 1, %s1442_s30 }
   0x7   : > { %p30_p0 = scmp.ge.s32.totalorder %s29_s11, 2  ;;  %p48_p1 = scmp.ne.s32.totalorder %s1426_s26, %s1422_s25 }
   0x8   : > { %p49_p2 = scmp.eq.s32.totalorder %s1446_s8, 0  ;;  %p223_p5 = scmp.eq.s32.totalorder %s1164_s9, 3 }
   0x9   : > { %s2084_s11 = smov (%p30_p0, %s29_s11), 0  ;;  %s2086_s12 = smov (!%p30_p0, %s32_s12), %s1442_s30 }
   0xa   : > { %s37_s13 = ssub.s32 %s1438_s29, %s2084_s11  ;;  %p1553_p3 = por %p49_p2, %p48_p1 }
   0xb   : > { %p34_p4 = scmp.ge.s32.totalorder %s2086_s12, 2  ;;  %p228_p6 = scmp.ne.s32.totalorder %s1422_s25, %s1418_s24 }
   0xc   : > { %p229_p7 = scmp.eq.s32.totalorder %s1165_s10, 3  ;;  %p1561_p8 = por %p223_p5, %p48_p1 }
   0xd   : > { %s2088_s12 = smov (%p34_p4, %s2086_s12), 0  ;;  %s41_s19 = sadd.s32 1, %s1426_s26 }
   0xe   : > { %2064 = sst [smem:[#allocation6_spill]] %s2088_s12  ;;  %p1565_p9 = por %p229_p7, %p228_p6 }
   0xf   : > { %s36_s17 = ssub.s32 %s1442_s30, %s2088_s12  ;;  %p1167_p11 = scmp.ge.s32.totalorder %s1446_s8, 4 }
  0x10   : > { %s38_s18 = sor.u32 %s37_s13, %s36_s17 }
  0x11   : > { %p39_p10 = scmp.eq.s32.totalorder %s38_s18, 0  ;;  %254 = sbr.rel (%p1167_p11) target bundleno = 30 (0x1e), region = 28 }
  0x13   : > { %s1573_s20 = scalar_select %p39_p10, %s1426_s26, %s41_s19  }
  0x16   : > { %257 = sbr.rel (!%p1553_p3) target bundleno = 30 (0x1e), region = 32  ;;  %s259_s21 = sand.u32 (%p1553_p3), 1, %s1426_s26  }
  0x17   : > { %s1169_s22 = sshll.u32 (%p1553_p3), %s1442_s30, 3  ;;  %s1168_s23 = sshll.u32 (%p1553_p3), %s259_s21, 4 }
  0x18   : > { %s263_s9 = sadd.s32 (%p1553_p3), %s1438_s29, %s1169_s22  ;;  %s261_s18 = scalar_lea.vmem (%p1553_p3), [#allocation2], %s1168_s23 }
  0x19   : > { %s1170_s10 = sshll.u32 (%p1553_p3), %s263_s9, 2 }
  0x1a   : > { %s265_s17 = scalar_lea.vmem (%p1553_p3), %s2054_s0, %s1170_s10 }
  0x1b   : > { %v282_v0 = vld [vmem:[%s265_s17] sm:$0xf]  ;;  %v284_v1 = vld [vmem:[%s265_s17 + $0x8] sm:$0xf]  ;;  %v286_v2 = vld [vmem:[%s265_s17 + $0x10] sm:$0xf] }
  0x1c   : > { %283 = vst [vmem:[%s261_s18] sm:$0xf] %v282_v0  ;;  %285 = vst [vmem:[%s261_s18 + $0x4] sm:$0xf] %v284_v1  ;;  %v288_v3 = vld [vmem:[%s265_s17 + $0x18] sm:$0xf] }
  0x1d   : > { %287 = vst [vmem:[%s261_s18 + $0x8] sm:$0xf] %v286_v2  ;;  %289 = vst [vmem:[%s261_s18 + $0xc] sm:$0xf] %v288_v3 }
  0x1e PF: > { %p1171_p12 = scmp.ge.s32.totalorder %s1446_s8, 1  ;;  %p347_p13 = scmp.lt.s32.totalorder %s1446_s8, 5 }
  0x20   : > { %p348_p0 = pnand %p1171_p12, %p347_p13 }
  0x21   : > { %p403_p1 = scmp.lt.s32.totalorder (!%p348_p0), %s1434_s28, 1  ;;  %s354_s19 = sand.u32 (!%p348_p0), 1, %s1422_s25  }
  0x22   : > { %351 = sbr.rel (%p348_p0) target bundleno = 523 (0x20b), region = 85  ;;  %s1608_s21 = sshll.u32 (!%p348_p0), %s354_s19, 4 }
  0x23   : > { %p405_p2 = scmp.lt.s32.totalorder (!%p348_p0), %s1430_s27, 1  ;;  %s402_s13 = scalar_lea.vmem (!%p348_p0), [#allocation3], %s1608_s21 }
  0x24   : > { %s1039_s17 = sshll.u32 (!%p348_p0), %s402_s13, 4  ;;  %s1994_s17 = int_to_ptr.vmem [resolvable:$true] %s1039_s17 }
  0x27   : > { %v1448_v4 = vmov 0   ;;  %s1588_s12 = scalar_select %p403_p1, %s1434_s28, 1  ;;  %v903_v13 = vld [vmem:[%s2059_s5 + $0x8] sm:$0xff]  ;;  %v902_v14 = vld [vmem:[%s2059_s5] sm:$0xff]  ;;  %v1449_v15 = vmov 0.0   ;;  %vm1450_vm1 = vmmov 0  }
  0x28   : > { %1335 = vset.pattern.permute.xlu1 %v1448_v4  ;;  %1334 = vset.pattern.permute.xlu0 %v1448_v4  ;;  %v1451_v55 = vmov 920167782   ;;  %v1452_v63 = vmov 2102212464   ;;  %v1453_v1 = vmov 1326507024  }
  0x29   : > { %s1205_s14 = sshll.u32 %s1588_s12, 5  ;;  %1221 = vmatprep.subr.bf16.mxu0 %v1449_v15  ;;  %1229 = vmatprep.subr.bf16.mxu1 %v1449_v15  ;;  %s1174_s9 = sshll.u32 %s1588_s12, 1 }
  0x2a   : > { %s420_s22 = scalar_lea.vmem %s2057_s3, %s1205_s14  ;;  %s415_s10 = scalar_lea.vmem %s2056_s2, %s1205_s14  ;;  %1231 = vmatprep.mubr.msk.bf16.mxu1 %vm1450_vm1, %v1449_v15  ;;  %1225 = vmatprep.mubr.msk.bf16.mxu0 %vm1450_vm1, %v1449_v15 }
  0x2b   : > { %v460_v5 = vld [vmem:[%s420_s22 + $0x10] sm:$0xff]  ;;  %v461_v7 = vld [vmem:[%s420_s22 + $0x18] sm:$0xff]  ;;  %v431_v9 = vld [vmem:[%s415_s10 + $0x8] sm:$0xff]  ;;  %s406_s23 = scalar_select %p405_p2, %s1430_s27, 1 }
  0x2c   : > { %v432_v6 = vld [vmem:[%s415_s10 + $0x10] sm:$0xff]  ;;  %474 = vperm.xlu1 %1335, %v460_v5   ;;  %v433_v8 = vld [vmem:[%s415_s10 + $0x18] sm:$0xff]  ;;  %v430_v10 = vld [vmem:[%s415_s10] sm:$0xff] }
  0x2d   : > { %446 = vperm.xlu0 %1334, %v432_v6   ;;  %v459_v11 = vld [vmem:[%s420_s22 + $0x8] sm:$0xff]  ;;  %v458_v12 = vld [vmem:[%s420_s22] sm:$0xff]  ;;  %s356_s22 = scalar_lea.vmem [#allocation2], %s1608_s21  ;;  %s408_s12 = sadd.s32 %s1174_s9, %s406_s23 }
  0x2e   : > { %v1215_v16 = vld [vmem:[%s356_s22 + $0x8] sm:$0xff]   ;;  %v1208_v25 = vld [vmem:[%s356_s22] sm:$0xff]   ;;  %s1175_s10 = sshll.u32 %s408_s12, 3  ;;  %s1201_s12 = sshll.u32 %s1434_s28, 2 }
  0x2f   : > { %v1213_v17 = vunpack.c.l.bf16 %v1215_v16  ;;  %v1214_v21 = vunpack.c.h.bf16 %v1215_v16  ;;  %v1210_v30 = vunpack.c.h.bf16 %v1208_v25  ;;  %v1209_v31 = vunpack.c.l.bf16 %v1208_v25  ;;  %s410_s18 = scalar_lea.vmem %s2055_s1, %s1175_s10  ;;  %s1036_s10 = sadd.s32 %s1430_s27, %s1201_s12 }
  0x30   : > { %479 = vperm.xlu1 %1335, %v461_v7   ;;  %s2003_s21 = scalar_lea.sflag [#allocation4], %s354_s19  ;;  %s1354_s22 = scalar_lea.vmem %s1994_s17, 256 }
  0x31   : > { %451 = vperm.xlu0 %1334, %v433_v8   ;;  %p1355_p3 = scmp.ne.s32.totalorder %s1994_s17, %s1354_s22  ;;  %s1457_s23 = smov [#allocation3]  }
  0x32   : > { %s1358_s9 = sshll.u32 %s1457_s23, 4  ;;  %s1359_s9 = int_to_ptr.vmem [resolvable:$false] %s1358_s9 }
  0x33   : > { %p1356_p4 = pnand %p1355_p3, %p1561_p8  ;;  %s1360_s12 = scalar_lea.vmem %s1359_s9, 512 }
  0x34   : > { %441 = vperm.xlu1 %1335, %v431_v9   ;;  %p1361_p6 = scmp.lt.s32.totalorder %s1994_s17, %s1359_s9  ;;  %p1362_p7 = scmp.lt.s32.totalorder %s1360_s12, %s1354_s22 }
  0x35   : > { %436 = vperm.xlu0 %1334, %v430_v10   ;;  %p1357_p5 = pneg %p1356_p4 }
  0x36   : > { %p1363_p10 = por %p1362_p7, %p1361_p6 }
  0x38   : > { %469 = vperm.xlu1 %1335, %v459_v11   ;;  %p1364_p11 = pnand %p1363_p10, %p1357_p5 }
  0x39   : > { %464 = vperm.xlu0 %1334, %v458_v12  }
  0x3c   : > { %911 = vperm.xlu1 %1335, %v903_v13  }
  0x3d   : > { %906 = vperm.xlu0 %1334, %v902_v14  }
  0xa7   : > { %v475_v18 = vpop.permute.xlu1 %474 }
  0xa8   : > { %v447_v19 = vpop.permute.xlu0 %446 }
  0xa9   : > { %v456_v20 = vmul.f32 %v1213_v17, %v447_v19 }
  0xab   : > { %v1611_v22 = vadd.f32 %v475_v18, %v456_v20  ;;  %v480_v23 = vpop.permute.xlu1 %479 }
  0xac   : > { %v452_v24 = vpop.permute.xlu0 %451 }
  0xad   : > { %v695_v26 = vand.u32 2139095040, %v1611_v22  ;;  %v457_v27 = vmul.f32 %v1214_v21, %v452_v24  ;;  %v692_v36 = vand.u32 2147483647, %v1611_v22 }
  0xaf   : > { %v696_v28 = vshrl.u32 %v695_v26, 23  ;;  %v1614_v29 = vadd.f32 %v480_v23, %v457_v27  ;;  %v442_v32 = vpop.permute.xlu1 %441  ;;  %v699_v49 = vand.u32 8388607, %v692_v36 }
  0xb0   : > { %v437_v33 = vpop.permute.xlu0 %436  ;;  %v455_v39 = vmul.f32 %v1210_v30, %v442_v32 }
  0xb1   : > { %v1188_v34 = vadd.s32 4294967169, %v696_v28  ;;  %v798_v35 = vand.u32 2139095040, %v1614_v29  ;;  %v454_v40 = vmul.f32 %v1209_v31, %v437_v33  ;;  %v700_v58 = vor.u32 8388608, %v699_v49 }
  0xb2   : > { %v795_v62 = vand.u32 2147483647, %v1614_v29  ;;  %v1454_v28 = vmov 683565275   ;;  %v1455_v31 = vmov 2475754826  }
  0xb3   : > { %v702_v37 = vadd.s32 1, %v1188_v34  ;;  %v799_v38 = vshrl.u32 %v798_v35, 23  ;;  %v470_v41 = vpop.permute.xlu1 %469  ;;  %v1658_v9 = vshll.u32 %v700_v58, 8 }
  0xb4   : > { %v465_v42 = vpop.permute.xlu0 %464  ;;  %v1618_v44 = vadd.f32 %v470_v41, %v455_v39  ;;  %v1662_v13 = vand.u32 8388607, %v795_v62 }
  0xb5   : > { %vm703_vm0 = vcmp.gt.s32.totalorder %v702_v37, 0  ;;  %v1192_v43 = vadd.s32 4294967169, %v799_v38  ;;  %v1620_v45 = vadd.f32 %v465_v42, %v454_v40  ;;  %v1456_v38 = vmov 2131351028  }
  0xb6   : > { %v704_v46 = vsel %vm703_vm0, %v702_v37, 0  ;;  %v589_v50 = vand.u32 2147483647, %v1618_v44  ;;  %v592_v51 = vand.u32 2139095040, %v1618_v44 }
  0xb7   : > { %v1622_v47 = vand.u32 31, %v704_v46  ;;  %v805_v48 = vadd.s32 1, %v1192_v43  ;;  %v486_v53 = vand.u32 2147483647, %v1620_v45  ;;  %v1636_v59 = vshrl.u32 %v704_v46, 5 }
  0xb8   : > { %v593_v54 = vshrl.u32 %v592_v51, 23  ;;  %v596_v61 = vand.u32 8388607, %v589_v50  ;;  %v489_v3 = vand.u32 2139095040, %v1620_v45 }
  0xb9   : > { %v1631_v52 = vsub.s32 32, %v1622_v47  ;;  %vm806_vm2 = vcmp.gt.s32.totalorder %v805_v48, 0  ;;  %v718_v0 = vshll.u32 %v1452_v63, %v1622_v47  ;;  %v493_v4 = vand.u32 8388607, %v486_v53 }
  0xba   : > { %v807_v57 = vsel %vm806_vm2, %v805_v48, 0  ;;  %v1184_v60 = vadd.s32 4294967169, %v593_v54  ;;  %v1656_v7 = vshll.u32 %v1451_v55, %v1622_v47  ;;  %v597_v10 = vor.u32 8388608, %v596_v61 }
  0xbb   : > { %v719_v56 = vshrl.u32 %v1451_v55, %v1631_v52  ;;  %v1645_v2 = vshrl.u32 %v1453_v1, %v1631_v52  ;;  %v1650_v5 = vand.u32 31, %v807_v57  ;;  %v490_v11 = vshrl.u32 %v489_v3, 23 }
  0xbc   : > { %v599_v8 = vadd.s32 1, %v1184_v60  ;;  %v494_v12 = vor.u32 8388608, %v493_v4  ;;  %vm727_vm3 = vcmp.lt.s32.totalorder %v1636_v59, 4  ;;  %v1667_v16 = vshrl.u32 %v807_v57, 5 }
  0xbd   : > { %v1652_v6 = vor.u32 %v719_v56, %v718_v0  ;;  %v723_v14 = vor.u32 %v1645_v2, %v1656_v7  ;;  %v1670_v17 = vsub.s32 32, %v1650_v5  ;;  %v1674_v18 = vshll.u32 %v1452_v63, %v1650_v5 }
  0xbe   : > { %vm600_vm4 = vcmp.gt.s32.totalorder %v599_v8, 0  ;;  %v1180_v20 = vadd.s32 4294967169, %v490_v11  ;;  %v1683_v23 = vshll.u32 %v1451_v55, %v1650_v5  ;;  %v1685_v26 = vshll.u32 %v597_v10, 8 }
  0xbf   : > { %v601_v19 = vsel %vm600_vm4, %v599_v8, 0  ;;  %v1679_v21 = vsel %vm727_vm3, %v1652_v6, 920167782  ;;  %v1687_v27 = vshll.u32 %v494_v12, 8  ;;  %v709_v30 = vshll.u32 %v1454_v28, %v1622_v47 }
  0xc0   : > { %v602_v24 = vshrl.u32 %v601_v19, 5  ;;  %v603_v25 = vand.u32 31, %v601_v19  ;;  %v710_v32 = vshrl.u32 %v1455_v31, %v1631_v52  ;;  %v496_v37 = vadd.s32 1, %v1180_v20 }
  0xc1   : > { %vm724_vm15 = vcmp.lt.s32.totalorder %v1636_v59, 1  ;;  %vm725_vm0 = vcmp.lt.s32.totalorder %v1636_v59, 2  ;;  %vm726_vm1 = vcmp.lt.s32.totalorder %v1636_v59, 3  ;;  %v815_v59 = vshll.u32 %v1455_v31, %v1650_v5 }
  0xc2   : > { %v604_v33 = vsub.s32 32, %v603_v25  ;;  %v606_v34 = vshll.u32 %v1454_v28, %v603_v25  ;;  %v609_v35 = vshll.u32 %v1455_v31, %v603_v25  ;;  %v612_v39 = vshll.u32 %v1456_v38, %v603_v25 }
  0xc3   : > { %v615_v40 = vshll.u32 %v1452_v63, %v603_v25  ;;  %v618_v41 = vshll.u32 %v1451_v55, %v603_v25  ;;  %vm621_vm5 = vcmp.lt.s32.totalorder %v602_v24, 1  ;;  %vm622_vm6 = vcmp.lt.s32.totalorder %v602_v24, 2 }
  0xc4   : > { %v607_v42 = vshrl.u32 %v1455_v31, %v604_v33  ;;  %v610_v43 = vshrl.u32 %v1456_v38, %v604_v33  ;;  %v613_v46 = vshrl.u32 %v1452_v63, %v604_v33  ;;  %v605_v48 = vshrl.u32 %v1454_v28, %v604_v33 }
  0xc5   : > { %v616_v49 = vshrl.u32 %v1451_v55, %v604_v33  ;;  %v619_v51 = vshrl.u32 %v1453_v1, %v604_v33  ;;  %vm623_vm7 = vcmp.lt.s32.totalorder %v602_v24, 3  ;;  %vm497_vm8 = vcmp.gt.s32.totalorder %v496_v37, 0 }
  0xc6   : > { %v608_v54 = vor.u32 %v607_v42, %v606_v34  ;;  %v611_v56 = vor.u32 %v610_v43, %v609_v35  ;;  %v614_v57 = vor.u32 %v613_v46, %v612_v39  ;;  %vm624_vm9 = vcmp.lt.s32.totalorder %v602_v24, 4 }
  0xc7   : > { %v617_v58 = vor.u32 %v616_v49, %v615_v40  ;;  %v620_v60 = vor.u32 %v619_v51, %v618_v41  ;;  %v498_v61 = vsel %vm497_vm8, %v496_v37, 0  ;;  %v1713_v39 = vor.u32 %v710_v32, %v709_v30 }
  0xc8   : > { %v625_v0 = vsel %vm621_vm5, %v605_v48, %v608_v54  ;;  %v626_v3 = vsel %vm624_vm9, %v614_v57, 2102212464  ;;  %v629_v4 = vsel %vm621_vm5, %v608_v54, %v611_v56  ;;  %v633_v8 = vsel %vm621_vm5, %v611_v56, %v614_v57 }
  0xc9   : > { %v627_v10 = vsel %vm623_vm7, %v611_v56, %v626_v3  ;;  %v630_v11 = vsel %vm624_vm9, %v617_v58, 920167782  ;;  %v634_v12 = vsel %vm624_vm9, %v620_v60, 1326507024  ;;  %v499_v19 = vshrl.u32 %v498_v61, 5 }
  0xca   : > { %v628_v20 = vsel %vm622_vm6, %v625_v0, %v627_v10  ;;  %v631_v25 = vsel %vm623_vm7, %v614_v57, %v630_v11  ;;  %v635_v33 = vsel %vm623_vm7, %v617_v58, %v634_v12  ;;  %v500_v34 = vand.u32 31, %v498_v61 }
  0xcb   : > { %v632_v35 = vsel %vm622_vm6, %v629_v4, %v631_v25  ;;  %v636_v37 = vsel %vm622_vm6, %v633_v8, %v635_v33  ;;  %v712_v40 = vshll.u32 %v1455_v31, %v1622_v47  ;;  %v644_v48 = vmul.u32 %v1685_v26, %v628_v20 }
  0xcc   : > { %v1718_v41 = vmul.u32.u64.low %v1685_v26, %v636_v37  ;;  %v1719_v42 = vmul.u32.u64.high %v1685_v26, %v636_v37, %v1718_v41  ;;  %v1722_v43 = vmul.u32.u64.low %v1685_v26, %v632_v35  ;;  %v1723_v46 = vmul.u32.u64.high %v1685_v26, %v632_v35, %v1722_v43 }
  0xcd   : > { %v501_v49 = vsub.s32 32, %v500_v34  ;;  %vm518_vm10 = vcmp.lt.s32.totalorder %v499_v19, 1  ;;  %v713_v24 = vshrl.u32 %v1456_v38, %v1631_v52  ;;  %v503_v30 = vshll.u32 %v1454_v28, %v500_v34 }
  0xce   : > { %v506_v32 = vshll.u32 %v1455_v31, %v500_v34  ;;  %v509_v51 = vshll.u32 %v1456_v38, %v500_v34  ;;  %v512_v54 = vshll.u32 %v1452_v63, %v500_v34  ;;  %v515_v26 = vshll.u32 %v1451_v55, %v500_v34 }
  0xcf   : > { %v504_v56 = vshrl.u32 %v1455_v31, %v501_v49  ;;  %v507_v57 = vshrl.u32 %v1456_v38, %v501_v49  ;;  %v510_v58 = vshrl.u32 %v1452_v63, %v501_v49  ;;  %vm646_vm11 = vc.u32 %v1719_v42, %v1722_v43 }
  0xd0   : > { %v647_v60 = vadd.s32 1, %v1723_v46  ;;  %v502_v61 = vshrl.u32 %v1454_v28, %v501_v49  ;;  %v513_v0 = vshrl.u32 %v1451_v55, %v501_v49  ;;  %v516_v10 = vshrl.u32 %v1453_v1, %v501_v49 }
  0xd1   : > { %v505_v3 = vor.u32 %v504_v56, %v503_v30  ;;  %v508_v4 = vor.u32 %v507_v57, %v506_v32  ;;  %v511_v8 = vor.u32 %v510_v58, %v509_v51  ;;  %vm520_vm12 = vcmp.lt.s32.totalorder %v499_v19, 3 }
  0xd2   : > { %v648_v11 = vsel %vm646_vm11, %v647_v60, %v1723_v46  ;;  %v514_v12 = vor.u32 %v513_v0, %v512_v54  ;;  %vm521_vm13 = vcmp.lt.s32.totalorder %v499_v19, 4  ;;  %v517_v25 = vor.u32 %v516_v10, %v515_v26 }
  0xd3   : > { %v649_v20 = vadd.s32 %v648_v11, %v644_v48  ;;  %v522_v33 = vsel %vm518_vm10, %v502_v61, %v505_v3  ;;  %v523_v34 = vsel %vm521_vm13, %v511_v8, 2102212464  ;;  %v526_v37 = vsel %vm518_vm10, %v505_v3, %v508_v4 }
  0xd4   : > { %v524_v35 = vsel %vm520_vm12, %v508_v4, %v523_v34  ;;  %v527_v41 = vsel %vm521_vm13, %v514_v12, 920167782  ;;  %v530_v30 = vsel %vm518_vm10, %v508_v4, %v511_v8  ;;  %vm519_vm14 = vcmp.lt.s32.totalorder %v499_v19, 2 }
  0xd5   : > { %v650_v32 = vadd.s32 536870912, %v649_v20  ;;  %v528_v46 = vsel %vm520_vm12, %v511_v8, %v527_v41  ;;  %v531_v49 = vsel %vm521_vm13, %v517_v25, 1326507024  ;;  %v525_v51 = vsel %vm519_vm14, %v522_v33, %v524_v35 }
  0xd6   : > { %v529_v54 = vsel %vm519_vm14, %v526_v37, %v528_v46  ;;  %v532_v48 = vsel %vm520_vm12, %v514_v12, %v531_v49  ;;  %v714_v56 = vor.u32 %v713_v24, %v712_v40  ;;  %v715_v19 = vshll.u32 %v1456_v38, %v1622_v47 }
  0xd7   : > { %v1750_v57 = vshrl.u32 %v650_v32, 30  ;;  %v533_v58 = vsel %vm519_vm14, %v530_v30, %v532_v48  ;;  %v1753_v26 = vmul.u32.u64.low %v1687_v27, %v529_v54  ;;  %v1754_v60 = vmul.u32.u64.high %v1687_v27, %v529_v54, %v1753_v26 }
  0xd8   : > { %v1759_v61 = vmul.u32.u64.low %v1687_v27, %v533_v58  ;;  %v1760_v0 = vmul.u32.u64.high %v1687_v27, %v533_v58, %v1759_v61  ;;  %v716_v40 = vshrl.u32 %v1452_v63, %v1631_v52  ;;  %v737_v24 = vsel %vm727_vm3, %v723_v14, 1326507024 }
  0xd9   : > { %v822_v3 = vshrl.u32 %v1451_v55, %v1670_v17  ;;  %v652_v4 = vshll.u32 %v1750_v57, 30  ;;  %v541_v8 = vmul.u32 %v1687_v27, %v525_v51  ;;  %v708_v47 = vshrl.u32 %v1454_v28, %v1631_v52 }
  0xda   : > { %v717_v10 = vor.u32 %v716_v40, %v715_v19  ;;  %v732_v2 = vsel %vm724_vm15, %v1713_v39, %v714_v56  ;;  %v544_v14 = vadd.s32 1, %v1754_v60  ;;  %vm543_vm2 = vc.u32 %v1760_v0, %v1753_v26 }
  0xdb   : > { %v1781_v7 = vsub.s32 %v649_v20, %v652_v4  ;;  %v738_v27 = vsel %vm726_vm1, %v1652_v6, %v737_v24  ;;  %v825_v11 = vshrl.u32 %v1453_v1, %v1670_v17  ;;  %v728_v34 = vsel %vm724_vm15, %v708_v47, %v1713_v39 }
  0xdc   : > { %v729_v52 = vsel %vm727_vm3, %v717_v10, 2102212464  ;;  %v734_v55 = vsel %vm726_vm1, %v717_v10, %v1679_v21  ;;  %v545_v20 = vsel %vm543_vm2, %v544_v14, %v1754_v60  ;;  %v736_v6 = vsel %vm724_vm15, %v714_v56, %v717_v10  ;;  %v966_v14 = vld [vmem:[%s410_s18] sm:$0xff]  ;;  %s1202_s18 = sshll.u32 %s1036_s10, 7 }
  0xdd   : > { %v655_v12 = vsub.s32 0, %v1781_v7  ;;  %v735_v25 = vsel %vm725_vm0, %v732_v2, %v734_v55  ;;  %v546_v33 = vadd.s32 %v545_v20, %v541_v8  ;;  %v730_v35 = vsel %vm726_vm1, %v714_v56, %v729_v52  ;;  %s1999_s27 = scalar_lea.hbm %s2061_s7, %s1202_s18 }
  0xde   : > { %v739_v1 = vsel %vm725_vm0, %v736_v6, %v738_v27  ;;  %v1811_v37 = vmul.u32.u64.low %v1658_v9, %v735_v25  ;;  %v1812_v41 = vmul.u32.u64.high %v1658_v9, %v735_v25, %v1811_v37  ;;  %v813_v39 = vshrl.u32 %v1455_v31, %v1670_v17 }
  0xdf   : > { %v1185_v21 = vmin.u32 %v655_v12, %v1781_v7  ;;  %v547_v30 = vadd.s32 536870912, %v546_v33  ;;  %v1816_v32 = vmul.u32.u64.low %v1658_v9, %v739_v1  ;;  %v1817_v46 = vmul.u32.u64.high %v1658_v9, %v739_v1, %v1816_v32 }
  0xe0   : > { %vm830_vm3 = vcmp.lt.s32.totalorder %v1667_v16, 4  ;;  %v731_v51 = vsel %vm725_vm0, %v728_v34, %v730_v35  ;;  %v816_v54 = vshrl.u32 %v1456_v38, %v1670_v17  ;;  %v823_v48 = vor.u32 %v822_v3, %v1674_v18 }
  0xe1   : > { %v657_v49 = vclz %v1185_v21  ;;  %v1827_v56 = vshrl.u32 %v547_v30, 30  ;;  %v812_v58 = vshll.u32 %v1454_v28, %v1650_v5  ;;  %v819_v60 = vshrl.u32 %v1452_v63, %v1670_v17 }
  0xe2   : > { %v826_v61 = vor.u32 %v825_v11, %v1683_v23  ;;  %v750_v19 = vadd.s32 1, %v1812_v41  ;;  %v818_v40 = vshll.u32 %v1456_v38, %v1650_v5  ;;  %v747_v24 = vmul.u32 %v1658_v9, %v731_v51  ;;  %v1336_v51 = vld [vmem:[%s2060_s6] sm:$0xff]  }
  0xe3   : > { %v549_v18 = vshll.u32 %v1827_v56, 30  ;;  %vm749_vm4 = vc.u32 %v1817_v46, %v1811_v37  ;;  %v814_v3 = vor.u32 %v813_v39, %v812_v58  ;;  %v1186_v63 = vadd.s32 4294967294, %v657_v49 }
  0xe4   : > { %v751_v4 = vsel %vm749_vm4, %v750_v19, %v1812_v41  ;;  %v817_v23 = vor.u32 %v816_v54, %v815_v59  ;;  %v820_v8 = vor.u32 %v819_v60, %v818_v40  ;;  %v836_v5 = vsel %vm830_vm3, %v823_v48, 920167782 }
  0xe5   : > { %v1849_v31 = vsub.s32 %v546_v33, %v549_v18  ;;  %v752_v38 = vadd.s32 %v751_v4, %v747_v24  ;;  %v840_v9 = vsel %vm830_vm3, %v826_v61, 1326507024  ;;  %v803_v47 = vor.u32 8388608, %v1662_v13 }
  0xe6   : > { %vm827_vm5 = vcmp.lt.s32.totalorder %v1667_v16, 1  ;;  %vm829_vm6 = vcmp.lt.s32.totalorder %v1667_v16, 3  ;;  %vm1187_vm7 = vcmp.lt.s32.totalorder %v1186_v63, 0  ;;  %vm828_vm8 = vcmp.lt.s32.totalorder %v1667_v16, 2 }
  0xe7   : > { %v552_v10 = vsub.s32 0, %v1849_v31  ;;  %v753_v2 = vadd.s32 536870912, %v752_v38  ;;  %v835_v52 = vsel %vm827_vm5, %v814_v3, %v817_v23  ;;  %v837_v55 = vsel %vm829_vm6, %v820_v8, %v836_v5 }
  0xe8   : > { %v839_v27 = vsel %vm827_vm5, %v817_v23, %v820_v8  ;;  %v841_v12 = vsel %vm829_vm6, %v823_v48, %v840_v9  ;;  %v843_v25 = vshll.u32 %v803_v47, 8  ;;  %v967_v33 = vpack.c.bf16 %v966_v14, %v966_v14 }
  0xe9   : > { %v1181_v13 = vmin.u32 %v552_v10, %v1849_v31  ;;  %v1864_v11 = vshrl.u32 %v753_v2, 30  ;;  %v842_v20 = vsel %vm828_vm8, %v839_v27, %v841_v12  ;;  %vm977_vm9 = vcmask 1043456  }
  0xea   : > { %v660_v34 = vsel %vm1187_vm7, 0, %v1186_v63  ;;  %v838_v21 = vsel %vm828_vm8, %v835_v52, %v837_v55  ;;  %v1874_v1 = vmul.u32.u64.low %v843_v25, %v842_v20  ;;  %v1875_v41 = vmul.u32.u64.high %v843_v25, %v842_v20, %v1874_v1 }
  0xeb   : > { %v554_v35 = vclz %v1181_v13  ;;  %v755_v6 = vshll.u32 %v1864_v11, 30  ;;  %v832_v39 = vsel %vm830_vm3, %v820_v8, 2102212464  ;;  %v979_v49 = vsel %vm977_vm9, %v967_v33, 0 }
  0xec   : > { %v665_v54 = vsub.s32 4294967266, %v660_v34  ;;  %v811_v48 = vshrl.u32 %v1454_v28, %v1670_v17  ;;  %v1884_v58 = vmul.u32.u64.low %v843_v25, %v838_v21  ;;  %v1885_v60 = vmul.u32.u64.high %v843_v25, %v838_v21, %v1884_v58  ;;  %1230 = vmatpush3.bf16.msra.mxu1 %v979_v49 }
  0xed   : > { %v1182_v30 = vadd.s32 4294967294, %v554_v35  ;;  %v756_v32 = vsub.s32 %v752_v38, %v755_v6  ;;  %vm973_vm11 = vcmask 64512   ;;  %v833_v40 = vsel %vm829_vm6, %v817_v23, %v832_v39 }
  0xee   : > { %v831_v59 = vsel %vm827_vm5, %v811_v48, %v814_v3  ;;  %v661_v63 = vsub.s32 32, %v660_v34  ;;  %v666_v17 = vadd.s32 127, %v665_v54  ;;  %vm852_vm12 = vc.u32 %v1875_v41, %v1884_v58 }
  0xef   : > { %vm1183_vm10 = vcmp.lt.s32.totalorder %v1182_v30, 0  ;;  %v758_v61 = vsub.s32 0, %v756_v32  ;;  %1232 = vmatmul.mubr.msk.bf16.vlgmr.msra.gmra.mxu1 %vm973_vm11, %v1336_v51  ;;  %v834_v4 = vsel %vm828_vm8, %v831_v59, %v833_v40  ;;  %v853_v8 = vadd.s32 1, %v1885_v60 }
  0xf0   : > { %v557_v19 = vsel %vm1183_vm10, 0, %v1182_v30  ;;  %v645_v3 = vadd.s32 %v1722_v43, %v1719_v42  ;;  %v667_v23 = vshll.u32 %v666_v17, 23  ;;  %v850_v47 = vmul.u32 %v843_v25, %v834_v4 }
  0xf1   : > { %v562_v18 = vsub.s32 4294967266, %v557_v19  ;;  %v1189_v24 = vmin.u32 %v758_v61, %v756_v32  ;;  %v558_v9 = vsub.s32 32, %v557_v19  ;;  %v854_v10 = vsel %vm852_vm12, %v853_v8, %v1885_v60 }
  0xf2   : > { %v663_v2 = vshrl.u32 %v645_v3, %v661_v63  ;;  %v542_v16 = vadd.s32 %v1753_v26, %v1760_v0  ;;  %v855_v55 = vadd.s32 %v854_v10, %v850_v47  ;;  %v662_v27 = vshll.u32 %v1781_v7, %v660_v34 }
  0xf3   : > { %v760_v28 = vclz %v1189_v24  ;;  %v563_v5 = vadd.s32 127, %v562_v18  ;;  %v668_v20 = vor.u32 4788187, %v667_v23  ;;  %v748_v43 = vadd.s32 %v1811_v37, %v1817_v46 }
  0xf4   : > { %v560_v42 = vshrl.u32 %v542_v16, %v558_v9  ;;  %v856_v25 = vadd.s32 536870912, %v855_v55  ;;  %v664_v33 = vor.u32 %v663_v2, %v662_v27  ;;  %v559_v6 = vshll.u32 %v1849_v31, %v557_v19 }
  0xf5   : > { %v1190_v38 = vadd.s32 4294967294, %v760_v28  ;;  %v564_v14 = vshll.u32 %v563_v5, 23  ;;  %v669_v30 = vand.u32 2147483647, %v668_v20  ;;  %vm591_vm14 = vcmp.lt.s32.totalorder %v1618_v44, 0 }
  0xf6   : > { %v1906_v26 = vshrl.u32 %v856_v25, 30  ;;  %v561_v39 = vor.u32 %v560_v42, %v559_v6  ;;  %v671_v51 = vcvt.s32.f32 %v664_v33  ;;  %vm1914_vm0 = vcmp.le.f32.partialorder %v589_v50, 0.7853982 }
  0xf7   : > { %vm1191_vm13 = vcmp.lt.s32.totalorder %v1190_v38, 0  ;;  %v565_v21 = vor.u32 4788187, %v564_v14  ;;  %vm488_vm1 = vcmp.lt.s32.totalorder %v1620_v45, 0  ;;  %vm1928_vm2 = vcmp.le.f32.partialorder %v486_v53, 0.7853982 }
  0xf8   : > { %v763_v52 = vsel %vm1191_vm13, 0, %v1190_v38  ;;  %v858_v34 = vshll.u32 %v1906_v26, 30  ;;  %v672_v46 = vmul.f32 %v671_v51, %v669_v30  ;;  %v568_v60 = vcvt.s32.f32 %v561_v39 }
  0xf9   : > { %v764_v13 = vsub.s32 32, %v763_v52  ;;  %v768_v12 = vsub.s32 4294967266, %v763_v52  ;;  %v765_v7 = vshll.u32 %v756_v32, %v763_v52  ;;  %v566_v54 = vand.u32 2147483647, %v565_v21 }
  0xfa   : > { %v859_v37 = vsub.s32 %v855_v55, %v858_v34  ;;  %v673_v18 = vxor.u32 2147483648, %v672_v46  ;;  %v851_v38 = vadd.s32 %v1884_v58, %v1875_v41  ;;  %vm694_vm3 = vcmp.lt.s32.totalorder %v1611_v22, 0 }
  0xfb   : > { %v769_v35 = vadd.s32 127, %v768_v12  ;;  %v766_v1 = vshrl.u32 %v748_v43, %v764_v13  ;;  %v569_v31 = vmul.f32 %v568_v60, %v566_v54  ;;  %vm1940_vm4 = vcmp.le.f32.partialorder %v692_v36, 0.7853982 }
  0xfc   : > { %v861_v59 = vsub.s32 0, %v859_v37  ;;  %v674_v32 = vsel %vm591_vm14, %v673_v18, %v672_v46  ;;  %v778_v36 = vsub.s32 4, %v1864_v11  ;;  %vm797_vm5 = vcmp.lt.s32.totalorder %v1614_v29, 0 }
  0xfd   : > { %v770_v0 = vshll.u32 %v769_v35, 23  ;;  %v767_v48 = vor.u32 %v766_v1, %v765_v7  ;;  %v570_v17 = vxor.u32 2147483648, %v569_v31  ;;  %v677_v47 = vsel %vm1914_vm0, %v1618_v44, %v674_v32 }
  0xfe   : > { %v1193_v40 = vmin.u32 %v861_v59, %v859_v37  ;;  %1338 = vcosq.f32 %v677_v47  ;;  %v675_v43 = vsub.s32 4, %v1750_v57  ;;  %vm1952_vm6 = vcmp.le.f32.partialorder %v795_v62, 0.7853982 }
  0xff   : > { %v771_v49 = vor.u32 4788187, %v770_v0  ;;  %v774_v19 = vcvt.s32.f32 %v767_v48  ;;  %v571_v3 = vsel %vm488_vm1, %v570_v17, %v569_v31  ;;  %1340 = vsinq.f32 %v677_v47 }
 0x100   : > { %v863_v63 = vclz %v1193_v40  ;;  %v574_v58 = vsel %vm1928_vm2, %v1620_v45, %v571_v3  ;;  %v572_v35 = vsub.s32 4, %v1827_v56  ;;  %v779_v21 = vsel %vm694_vm3, %v778_v36, %v1864_v11  ;;  %v912_v36 = vpop.permute.xlu1 %911 }
 0x101   : > { %v772_v61 = vand.u32 2147483647, %v771_v49  ;;  %1342 = vcosq.f32 %v574_v58  ;;  %v881_v62 = vsub.s32 4, %v1906_v26  ;;  %v676_v0 = vsel %vm591_vm14, %v675_v43, %v1750_v57 }
 0x102   : > { %v1194_v28 = vadd.s32 4294967294, %v863_v63  ;;  %1344 = vsinq.f32 %v574_v58  ;;  %v573_v39 = vsel %vm488_vm1, %v572_v35, %v1827_v56  ;;  %v781_v34 = vsel %vm1940_vm4, 0, %v779_v21 }
 0x103   : > { %v775_v24 = vmul.f32 %v774_v19, %v772_v61  ;;  %v678_v11 = vsel %vm1914_vm0, 0, %v676_v0  ;;  %v882_v54 = vsel %vm797_vm5, %v881_v62, %v1906_v26  ;;  %v575_v57 = vsel %vm1928_vm2, 0, %v573_v39 }
 0x104   : > { %vm1195_vm15 = vcmp.lt.s32.totalorder %v1194_v28, 0  ;;  %v682_v46 = vand.u32 3, %v678_v11  ;;  %v884_v56 = vsel %vm1952_vm6, 0, %v882_v54  ;;  %v579_v60 = vand.u32 3, %v575_v57 }
 0x105   : > { %v776_v4 = vxor.u32 2147483648, %v775_v24  ;;  %v866_v5 = vsel %vm1195_vm15, 0, %v1194_v28  ;;  %vm784_vm2 = vweird.f32 %v1611_v22 }
 0x106   : > { %v867_v23 = vsub.s32 32, %v866_v5  ;;  %v871_v9 = vsub.s32 4294967266, %v866_v5  ;;  %v868_v2 = vshll.u32 %v859_v37, %v866_v5  ;;  %v785_v37 = vand.u32 3, %v781_v34 }
 0x107   : > { %v777_v10 = vsel %vm694_vm3, %v776_v4, %v775_v24  ;;  %v888_v24 = vand.u32 3, %v884_v56  ;;  %vm684_vm9 = vcmp.eq.s32.totalorder %v682_v46, 0  ;;  %vm687_vm10 = vcmp.eq.s32.totalorder %v682_v46, 2 }
 0x108   : > { %v869_v16 = vshrl.u32 %v851_v38, %v867_v23  ;;  %v872_v41 = vadd.s32 127, %v871_v9  ;;  %v780_v55 = vsel %vm1940_vm4, %v1611_v22, %v777_v10  ;;  %vm787_vm7 = vcmp.eq.s32.totalorder %v785_v37, 0  ;;  %v1337_v22 = vld [vmem:[%s2058_s4] sm:$0xff]  }
 0x109   : > { %1346 = vcosq.f32 %v780_v55  ;;  %vm790_vm8 = vcmp.eq.s32.totalorder %v785_v37, 2  ;;  %vm581_vm11 = vcmp.eq.s32.totalorder %v579_v60, 0  ;;  %vm584_vm12 = vcmp.eq.s32.totalorder %v579_v60, 2 }
 0x10a   : > { %v870_v14 = vor.u32 %v869_v16, %v868_v2  ;;  %v873_v52 = vshll.u32 %v872_v41, 23  ;;  %1348 = vsinq.f32 %v780_v55  ;;  %vm786_vm13 = vcmp.lt.s32.totalorder %v785_v37, 2 }
 0x10b   : > { %v1339_v1 = vpop.eup %1338  ;;  %vm580_vm14 = vcmp.lt.s32.totalorder %v579_v60, 2  ;;  %vm890_vm15 = vcmp.eq.s32.totalorder %v888_v24, 0  ;;  %vm893_vm0 = vcmp.eq.s32.totalorder %v888_v24, 2  ;;  %vm683_vm1 = vcmp.lt.s32.totalorder %v682_v46, 2 }
 0x10c   : > { %v874_v27 = vor.u32 4788187, %v873_v52  ;;  %v877_v12 = vcvt.s32.f32 %v870_v14  ;;  %v1341_v30 = vpop.eup %1340  ;;  %v688_v59 = vxor.u32 2147483648, %v1339_v1  ;;  %vm889_vm3 = vcmp.lt.s32.totalorder %v888_v24, 2 }
 0x10d   : > { %v685_v61 = vxor.u32 2147483648, %v1341_v30  ;;  %vm887_vm4 = vweird.f32 %v1614_v29 }
 0x10e   : > { %v875_v13 = vand.u32 2147483647, %v874_v27  ;;  %v1343_v7 = vpop.eup %1342  ;;  %v689_v63 = vsel %vm687_vm10, %v688_v59, %v1341_v30  ;;  %v907_v27 = vpop.permute.xlu0 %906 }
 0x10f   : > { %v1345_v49 = vpop.eup %1344  ;;  %v585_v18 = vxor.u32 2147483648, %v1343_v7  ;;  %v686_v26 = vsel %vm684_vm9, %v1339_v1, %v685_v61 }
 0x110   : > { %v878_v20 = vmul.f32 %v877_v12, %v875_v13  ;;  %v582_v40 = vxor.u32 2147483648, %v1345_v49  ;;  %v690_v50 = vsel %vm683_vm1, %v686_v26, %v689_v63 }
 0x111   : > { %v586_v8 = vsel %vm584_vm12, %v585_v18, %v1345_v49 }
 0x112   : > { %v879_v42 = vxor.u32 2147483648, %v878_v20  ;;  %v583_v4 = vsel %vm581_vm11, %v1343_v7, %v582_v40 }
 0x113   : > { %v587_v47 = vsel %vm580_vm14, %v583_v4, %v586_v8 }
 0x114   : > { %v880_v33 = vsel %vm797_vm5, %v879_v42, %v878_v20  ;;  %vm578_vm5 = vweird.f32 %v1620_v45 }
 0x115   : > { %v883_v6 = vsel %vm1952_vm6, %v1614_v29, %v880_v33  ;;  %vm681_vm6 = vweird.f32 %v1618_v44  ;;  %v588_v58 = vsel %vm578_vm5, nan, %v587_v47 }
 0x116   : > { %1350 = vcosq.f32 %v883_v6  ;;  %v1347_v51 = vpop.eup %1346  ;;  %v691_v53 = vsel %vm681_vm6, nan, %v690_v50 }
 0x117   : > { %1352 = vsinq.f32 %v883_v6  ;;  %v1349_v48 = vpop.eup %1348  ;;  %v791_v19 = vxor.u32 2147483648, %v1347_v51  ;;  %v900_v52 = vpack.c.bf16 %v691_v53, %v588_v58 }
 0x118   : > { %v788_v31 = vxor.u32 2147483648, %v1349_v48 }
 0x119   : > { %v792_v32 = vsel %vm790_vm8, %v791_v19, %v1349_v48 }
 0x11a   : > { %v789_v28 = vsel %vm787_vm7, %v1347_v51, %v788_v31  ;;  %vm919_vm7 = vcmask 261120  }
 0x11b   : > { %v793_v23 = vsel %vm786_vm13, %v789_v28, %v792_v32 }
 0x11c   : > { %v794_v16 = vsel %vm784_vm2, nan, %v793_v23 }
 0x123   : > { %v1351_v17 = vpop.eup %1350 }
 0x124   : > { %v1353_v5 = vpop.eup %1352  ;;  %v894_v3 = vxor.u32 2147483648, %v1351_v17 }
 0x125   : > { %v891_v38 = vxor.u32 2147483648, %v1353_v5 }
 0x126   : > { %v895_v9 = vsel %vm893_vm0, %v894_v3, %v1353_v5 }
 0x127   : > { %v892_v10 = vsel %vm890_vm15, %v1351_v17, %v891_v38 }
 0x128   : > { %v896_v2 = vsel %vm889_vm3, %v892_v10, %v895_v9 }
 0x129   : > { %v897_v41 = vsel %vm887_vm4, nan, %v896_v2 }
 0x12a   : > { %v901_v14 = vpack.c.bf16 %v897_v41, %v794_v16 }
 0x12c   : > { %1222 = vmatpush3.bf16.msra.mxu0 %v901_v14 }
 0x12d   : > { %1223 = vmatprep.subr.bf16.mxu0 %v1449_v15 }
 0x130   : > { %1224 = vmatpush3.bf16.msra.mxu0 %v900_v52 }
 0x133   : > { %1226 = vmatmul.mubr.msk.bf16.vlgmr.msra.gmra.mxu0 %vm919_vm7, %v1337_v22 }
 0x1af   : > { %v1015_v29 = vpop.f32.mrf.mxu1 }
 0x1b1   : > { %v1233_v44 = vpop.f32.mrf.mxu1 }
 0x1b3   : > { %v1018_v45 = vpop.f32.mrf.mxu1 }
 0x1b5   : > { %v1234_v55 = vpop.f32.mrf.mxu1 }
 0x1f3   : > { %v957_v13 = vpop.f32.mrf.mxu0 }
 0x1f4   : > { %v958_v12 = vadd.f32 %v957_v13, %v907_v27 }
 0x1f5   : > { %v1227_v15 = vpop.f32.mrf.mxu0 }
 0x1f6   : > { %v1016_v20 = vadd.f32 %v1015_v29, %v958_v12 }
 0x1f7   : > { %v960_v42 = vpop.f32.mrf.mxu0 }
 0x1f8   : > { %1022 = vst [vmem:[%s402_s13] sm:$0xff] %v1016_v20  ;;  %v961_v43 = vadd.f32 %v960_v42, %v912_v36 }
 0x1f9   : > { %v1228_v25 = vpop.f32.mrf.mxu0 }
 0x1fa   : > { %v1019_v33 = vadd.f32 %v1018_v45, %v961_v43 }
 0x1fc   : > { %1023 = vst [vmem:[%s402_s13 + $0x8] sm:$0xff] %v1019_v33 }
 0x1fd   : > { %1367 = shalt.err (!%p1364_p11)
}
 0x1fe   : > { %s1368_s19 = scalar_lea.hbm %s1999_s27, 256  ;;  %s1372_s18 = scalar_lea.hbm %s2061_s7, 1024 }
 0x1ff   : > { %p1369_p12 = scmp.ne.s32.totalorder %s1999_s27, %s1368_s19  ;;  %p1373_p1 = scmp.lt.s32.totalorder %s1999_s27, %s2061_s7 }
 0x200   : > { %p1374_p2 = scmp.lt.s32.totalorder %s1372_s18, %s1368_s19 }
 0x201   : > { %p1370_p13 = pnand %p1369_p12, %p1561_p8 }
 0x202   : > { %p1375_p3 = por %p1374_p2, %p1373_p1 }
 0x203   : > { %p1371_p0 = pneg %p1370_p13 }
 0x205   : > { %p1376_p4 = pnand %p1375_p3, %p1371_p0 }
 0x207   : > { %1379 = shalt.err (!%p1376_p4)
}
 0x208   : > { %s1458_s22 = smov 128   ;;  %s1459_s23 = smov 256  }
 0x209   : > { %s1460_s9 = smov 8  }
 0x20a   : > { %1251 = dma.vmem_to_hbm [thread:$0]  (%p1561_p8), %s1994_s17, 256, %s1999_s27, %s2003_s21, %s1458_s22, %s1459_s23, %s1460_s9  }
 0x20b PF: > { %p1257_p5 = scmp.ge.s32.totalorder %s1446_s8, 2  ;;  %s1054_s12 = sand.u32 1, %s1418_s24  }
 0x20c   : > { %s1055_s19 = scalar_lea.sflag [#allocation4], %s1054_s12 }
 0x20d   : > { %p1254_p6 = pnand %p1257_p5, %p1565_p9 }
 0x20f   : > { %p1255_p7 = pneg %p1254_p6 }
 0x211   : > { %1413 = dma.done.wait (%p1255_p7), %s1055_s19, 256  }
 0x212   : > { %1415 = vsyncadd (%p1255_p7), %s1055_s19, 4294967040  ;;  %s20_s8 = sadd.s32 1, %s1446_s8   ;;  %s2075_s15 = sld [smem:[#allocation6_spill]] }
 0x213   : > { %p17_p10 = scmp.ge.s32.totalorder %s20_s8, 6   ;;  %s2076_s24 = smov %s1422_s25 }
 0x214   : > { %s2077_s25 = smov %s1426_s26  ;;  %s2078_s26 = smov %s1573_s20 }
 0x215   : > { %s2079_s27 = smov %s1438_s29  ;;  %s2080_s28 = smov %s1442_s30 }
 0x216   : > { %s2081_s29 = smov %s2084_s11  ;;  %19 = sbr.rel (!%p17_p10) target bundleno = 5 (0x5), region = 138 }
 0x218   : > { %s2082_s30 = smov %s2075_s15 }
 0x21b   :  { %1060 = vsyncpa [#allocation4], 1 }
 0x21c   :  { %1062 = vsyncpa [#allocation4 + $0x1], 1 }

// kernel: cresnet_block_conv1d.4
= control target key start
LH: loop header
LB: loop body
LE: loop exit
PB: predicated region body
PF: predicated region fallthrough
CT: control target
= control target key end

     0   :  { %s1317_s0 = inlined_call_operand.vmem [shape: f32[2,8,256], index: 0, kind: input, shape index: {}]   ;;  %s1318_s1 = inlined_call_operand.vmem [shape: f32[2,8,1], index: 1, kind: input, shape index: {}]   ;;  %s1319_s2 = inlined_call_operand.vmem [shape: f32[2,8,1], index: 2, kind: input, shape index: {}]   ;;  %s1320_s3 = inlined_call_operand.vmem [shape: bf16[32,8], index: 3, kind: input, shape index: {}]   ;;  %s1321_s4 = inlined_call_operand.vmem [shape: f32[32,1], index: 4, kind: input, shape index: {}]   ;;  %s1322_s5 = inlined_call_operand.vmem [shape: bf16[2,32,256], index: 5, kind: output, shape index: {0}]   ;;  %s1323_s6 = inlined_call_operand.vmem [shape: f32[2,2,32,1], index: 6, kind: output, shape index: {1}]   ;;  %s1324_s7 = inlined_call_operand.vmem [shape: f32[2,2,32,1], index: 7, kind: output, shape index: {2}]  }
   0x1   :  { %1325 = sst [smem:[#allocation3_spill]] %s1318_s1 }
   0x2   :  { %s1144_s24 = smov 0   ;;  %s1146_s25 = smov 0  }
   0x3   :  { %s1148_s26 = smov 0   ;;  %s1150_s27 = smov 0  }
   0x4   :  { %s1152_s28 = smov 0   ;;  %s1154_s29 = smov 0  }
   0x5   :  { %s1156_s30 = smov 0  }
   0x6 LB: > { %s27_s8 = sadd.s32 1, %s1087_s28  ;;  %s30_s9 = sadd.s32 1, %s1091_s29  ;;  %s1095_s30 = sphi %s1156_s30, %s18_s30   ;;  %s1091_s29 = sphi %s1154_s29, %s1333_s29   ;;  %s1087_s28 = sphi %s1152_s28, %s1332_s28   ;;  %s1083_s27 = sphi %s1150_s27, %s1331_s27   ;;  %s1079_s26 = sphi %s1148_s26, %s1330_s26   ;;  %s1075_s25 = sphi %s1146_s25, %s1329_s25   ;;  %s1071_s24 = sphi %s1144_s24, %s1328_s24  }
   0x7   : > { %p28_p0 = scmp.ge.s32.totalorder %s27_s8, 2  ;;  %s908_s10 = sadd.s32 4294967295, %s1095_s30  }
   0x8   : > { %p171_p1 = scmp.ne.s32.totalorder %s1075_s25, %s1071_s24  ;;  %p172_p2 = scmp.eq.s32.totalorder %s908_s10, 3 }
   0x9   : > { %s1335_s8 = smov (%p28_p0, %s27_s8), 0  ;;  %s1337_s9 = smov (!%p28_p0, %s30_s9), %s1091_s29 }
   0xa   : > { %s157_s11 = ssub.s32 %s1087_s28, %s1335_s8  ;;  %p32_p3 = scmp.ge.s32.totalorder %s1337_s9, 2 }
   0xb   : > { %p912_p4 = scmp.ge.s32.totalorder %s1095_s30, 1  ;;  %p1190_p5 = por %p172_p2, %p171_p1 }
   0xc   : > { %p283_p6 = scmp.lt.s32.totalorder %s1095_s30, 5  ;;  %s1339_s9 = smov (%p32_p3, %s1337_s9), 0 }
   0xd   : > { %s156_s13 = ssub.s32 %s1091_s29, %s1339_s9  ;;  %s161_s15 = sadd.s32 1, %s1075_s25 }
   0xe   : > { %p284_p7 = pnand %p912_p4, %p283_p6  ;;  %s158_s14 = sor.u32 %s157_s11, %s156_s13 }
   0xf   : > { %p159_p8 = scmp.eq.s32.totalorder %s158_s14, 0  ;;  %p343_p9 = scmp.lt.s32.totalorder (!%p284_p7), %s1083_s27, 1 }
  0x10   : > { %287 = sbr.rel (%p284_p7) target bundleno = 594 (0x252), region = 40  ;;  %s1327_s1 = sld [smem:[#allocation3_spill]] (!%p284_p7) }
  0x11   : > { %s1201_s16 = scalar_select %p159_p8, %s1075_s25, %s161_s15  }
  0x12   : > { %p345_p10 = scmp.lt.s32.totalorder (!%p284_p7), %s1079_s26, 1 }
  0x15   : > { %v1097_v0 = vmov 0   ;;  %s344_s17 = scalar_select %p343_p9, %s1083_s27, 1  ;;  %v503_v3 = vld [vmem:[%s1321_s4 + $0x10] sm:$0xff]  ;;  %v1035_v4 = vld [vmem:[%s1320_s3] sm:$0xff]   ;;  %vm535_vm0 = vcmask 64512   ;;  %v502_v6 = vld [vmem:[%s1321_s4 + $0x8] sm:$0xff] }
  0x16   : > { %1033 = vset.pattern.permute.xlu0 %v1097_v0  ;;  %1034 = vset.pattern.permute.xlu1 %v1097_v0  ;;  %v501_v5 = vld [vmem:[%s1321_s4] sm:$0xff]  ;;  %v504_v7 = vld [vmem:[%s1321_s4 + $0x18] sm:$0xff]  ;;  %s1233_s11 = scalar_select %p345_p10, %s1079_s26, 1  ;;  %v1098_v24 = vmov 2102212464   ;;  %vm542_vm14 = vcmask 1043456  }
  0x17   : > { %s1205_s18 = sshll.u32 %s344_s17, 3  ;;  %961 = vmatprep.mubr.msk.bf16.mxu0 %vm535_vm0, %v1035_v4  ;;  %507 = vperm.xlu1 %1034, %v501_v5   ;;  %s914_s13 = sshll.u32 %s344_s17, 1  ;;  %v1099_v26 = vmov 920167782   ;;  %v1100_v30 = vmov 1326507024  }
  0x18   : > { %s354_s21 = scalar_lea.vmem %s1327_s1, %s1205_s18  ;;  %s358_s10 = scalar_lea.vmem %s1319_s2, %s1205_s18  ;;  %v1101_v32 = vmov 683565275   ;;  %v1102_v34 = vmov 2475754826   ;;  %v1103_v37 = vmov 2131351028  }
  0x19   : > { %v379_v1 = vld [vmem:[%s354_s21] sm:$0xff]  ;;  %s348_s14 = sadd.s32 %s914_s13, %s1233_s11  ;;  %s318_s21 = sand.u32 1, %s1071_s24   ;;  %vm623_vm15 = vcmask 7168  }
  0x1a   : > { %382 = vperm.xlu0 %1033, %v379_v1   ;;  %v386_v2 = vld [vmem:[%s358_s10] sm:$0xff]  ;;  %s915_s15 = sshll.u32 %s348_s14, 3  ;;  %s913_s22 = sshll.u32 %s318_s21, 4 }
  0x1b   : > { %512 = vperm.xlu1 %1034, %v502_v6   ;;  %s350_s1 = scalar_lea.vmem %s1317_s0, %s915_s15  ;;  %s1265_s23 = scalar_lea.vmem [#allocation2], %s913_s22 }
  0x1c   : > { %v378_v9 = vld [vmem:[%s350_s1] sm:$0xff]  ;;  %s918_s24 = sshll.u32 %s1233_s11, 2 }
  0x1d   : > { %s365_s10 = sadd.s32 %s918_s24, %s1205_s18  ;;  %s937_s18 = sshll.u32 (%p1190_p5), %s1083_s27, 3 }
  0x1e   : > { %389 = vperm.xlu0 %1033, %v386_v2   ;;  %s920_s13 = sshll.u32 %s365_s10, 3  ;;  %s670_s11 = sadd.s32 (%p1190_p5), %s1079_s26, %s937_s18 }
  0x1f   : > { %522 = vperm.xlu1 %1034, %v504_v7   ;;  %s367_s19 = scalar_lea.vmem %s1323_s6, %s920_s13  ;;  %s376_s17 = scalar_lea.vmem %s1324_s7, %s920_s13 }
  0x20   : > { %s938_s21 = sshll.u32 (%p1190_p5), %s670_s11, 2 }
  0x21   : > { %s672_s10 = scalar_lea.vmem (%p1190_p5), %s1322_s5, %s938_s21 }
  0x22   : > { %517 = vperm.xlu0 %1033, %v503_v3  }
  0x95   : > { %v383_v8 = vpop.permute.xlu0 %382 }
  0x96   : > { %v385_v10 = vmul.f32 %v383_v8, %v378_v9 }
  0x99   : > { %v390_v11 = vpop.permute.xlu0 %389 }
  0x9a   : > { %v1239_v12 = vadd.f32 %v390_v11, %v385_v10 }
  0x9c   : > { %v396_v13 = vand.u32 2139095040, %v1239_v12  ;;  %v393_v14 = vand.u32 2147483647, %v1239_v12  ;;  %vm395_vm8 = vcmp.lt.s32.totalorder %v1239_v12, 0  ;;  %vm485_vm13 = vweird.f32 %v1239_v12 }
  0x9e   : > { %v397_v15 = vshrl.u32 %v396_v13, 23  ;;  %v400_v17 = vand.u32 8388607, %v393_v14  ;;  %vm394_vm9 = vcmp.le.f32.partialorder %v393_v14, 0.7853982 }
  0xa0   : > { %v924_v16 = vadd.s32 4294967169, %v397_v15  ;;  %v401_v20 = vor.u32 8388608, %v400_v17 }
  0xa2   : > { %v403_v18 = vadd.s32 1, %v924_v16  ;;  %v441_v28 = vshll.u32 %v401_v20, 8 }
  0xa4   : > { %vm404_vm1 = vcmp.gt.s32.totalorder %v403_v18, 0 }
  0xa5   : > { %v405_v19 = vsel %vm404_vm1, %v403_v18, 0 }
  0xa6   : > { %v407_v21 = vand.u32 31, %v405_v19  ;;  %v406_v22 = vshrl.u32 %v405_v19, 5 }
  0xa8   : > { %v408_v23 = vsub.s32 32, %v407_v21  ;;  %v419_v25 = vshll.u32 %v1098_v24, %v407_v21  ;;  %v422_v27 = vshll.u32 %v1099_v26, %v407_v21  ;;  %v410_v33 = vshll.u32 %v1101_v32, %v407_v21 }
  0xa9   : > { %v413_v36 = vshll.u32 %v1102_v34, %v407_v21  ;;  %v416_v39 = vshll.u32 %v1103_v37, %v407_v21  ;;  %vm428_vm2 = vcmp.lt.s32.totalorder %v406_v22, 4  ;;  %vm425_vm3 = vcmp.lt.s32.totalorder %v406_v22, 1 }
  0xaa   : > { %v420_v29 = vshrl.u32 %v1099_v26, %v408_v23  ;;  %v423_v31 = vshrl.u32 %v1100_v30, %v408_v23  ;;  %v411_v35 = vshrl.u32 %v1102_v34, %v408_v23  ;;  %v414_v38 = vshrl.u32 %v1103_v37, %v408_v23 }
  0xab   : > { %v417_v40 = vshrl.u32 %v1098_v24, %v408_v23  ;;  %v409_v44 = vshrl.u32 %v1101_v32, %v408_v23  ;;  %vm426_vm4 = vcmp.lt.s32.totalorder %v406_v22, 2  ;;  %vm427_vm5 = vcmp.lt.s32.totalorder %v406_v22, 3 }
  0xac   : > { %v421_v41 = vor.u32 %v420_v29, %v419_v25  ;;  %v424_v42 = vor.u32 %v423_v31, %v422_v27  ;;  %v412_v43 = vor.u32 %v411_v35, %v410_v33  ;;  %v415_v45 = vor.u32 %v414_v38, %v413_v36 }
  0xad   : > { %v418_v46 = vor.u32 %v417_v40, %v416_v39 }
  0xae   : > { %v434_v47 = vsel %vm428_vm2, %v421_v41, 920167782  ;;  %v438_v48 = vsel %vm428_vm2, %v424_v42, 1326507024  ;;  %v433_v50 = vsel %vm425_vm3, %v412_v43, %v415_v45  ;;  %v429_v53 = vsel %vm425_vm3, %v409_v44, %v412_v43  ;;  %v1036_v42 = vld [vmem:[%s1320_s3 + $0x8] sm:$0xff]   ;;  %v508_v43 = vpop.permute.xlu1 %507 }
  0xaf   : > { %v430_v49 = vsel %vm428_vm2, %v418_v46, 2102212464  ;;  %v435_v51 = vsel %vm427_vm5, %v418_v46, %v434_v47  ;;  %v437_v52 = vsel %vm425_vm3, %v415_v45, %v418_v46  ;;  %v439_v56 = vsel %vm427_vm5, %v421_v41, %v438_v48 }
  0xb0   : > { %v431_v54 = vsel %vm427_vm5, %v415_v45, %v430_v49  ;;  %v436_v55 = vsel %vm426_vm4, %v433_v50, %v435_v51  ;;  %v440_v57 = vsel %vm426_vm4, %v437_v52, %v439_v56  ;;  %v518_v45 = vpop.permute.xlu0 %517 }
  0xb1   : > { %v1245_v58 = vmul.u32.u64.low %v441_v28, %v436_v55  ;;  %v1246_v59 = vmul.u32.u64.high %v441_v28, %v436_v55, %v1245_v58  ;;  %v1248_v60 = vmul.u32.u64.low %v441_v28, %v440_v57  ;;  %v1249_v61 = vmul.u32.u64.high %v441_v28, %v440_v57, %v1248_v60 }
  0xb2   : > { %v432_v62 = vsel %vm426_vm4, %v429_v53, %v431_v54  ;;  %v513_v44 = vpop.permute.xlu1 %512 }
  0xb3   : > { %v451_v63 = vadd.s32 1, %v1246_v59  ;;  %v448_v0 = vmul.u32 %v441_v28, %v432_v62  ;;  %vm450_vm6 = vc.u32 %v1249_v61, %v1245_v58  ;;  %v449_v13 = vadd.s32 %v1245_v58, %v1249_v61 }
  0xb5   : > { %v452_v1 = vsel %vm450_vm6, %v451_v63, %v1246_v59 }
  0xb6   : > { %v453_v2 = vadd.s32 %v452_v1, %v448_v0  ;;  %v523_v49 = vpop.permute.xlu1 %522 }
  0xb8   : > { %v454_v3 = vadd.s32 536870912, %v453_v2 }
  0xba   : > { %v455_v4 = vshrl.u32 %v454_v3, 30 }
  0xbc   : > { %v456_v5 = vshll.u32 %v455_v4, 30  ;;  %v479_v29 = vsub.s32 4, %v455_v4 }
  0xbe   : > { %v457_v6 = vsub.s32 %v453_v2, %v456_v5  ;;  %v480_v30 = vsel %vm395_vm8, %v479_v29, %v455_v4 }
  0xbf   : > { %v482_v31 = vsel %vm394_vm9, 0, %v480_v30 }
  0xc0   : > { %v459_v7 = vsub.s32 0, %v457_v6  ;;  %v486_v32 = vand.u32 3, %v482_v31 }
  0xc2   : > { %v925_v8 = vmin.u32 %v459_v7, %v457_v6  ;;  %vm491_vm10 = vcmp.eq.s32.totalorder %v486_v32, 2  ;;  %vm488_vm11 = vcmp.eq.s32.totalorder %v486_v32, 0  ;;  %vm487_vm12 = vcmp.lt.s32.totalorder %v486_v32, 2 }
  0xc4   : > { %v461_v9 = vclz %v925_v8 }
  0xc6   : > { %v926_v10 = vadd.s32 4294967294, %v461_v9 }
  0xc8   : > { %vm927_vm7 = vcmp.lt.s32.totalorder %v926_v10, 0 }
  0xc9   : > { %v464_v11 = vsel %vm927_vm7, 0, %v926_v10 }
  0xca   : > { %v465_v15 = vsub.s32 32, %v464_v11  ;;  %v469_v16 = vsub.s32 4294967266, %v464_v11  ;;  %v466_v17 = vshll.u32 %v457_v6, %v464_v11 }
  0xcc   : > { %v467_v18 = vshrl.u32 %v449_v13, %v465_v15  ;;  %v470_v19 = vadd.s32 127, %v469_v16 }
  0xce   : > { %v468_v20 = vor.u32 %v467_v18, %v466_v17  ;;  %v471_v21 = vshll.u32 %v470_v19, 23 }
  0xd0   : > { %v472_v22 = vor.u32 4788187, %v471_v21  ;;  %v475_v24 = vcvt.s32.f32 %v468_v20 }
  0xd2   : > { %v473_v23 = vand.u32 2147483647, %v472_v22 }
  0xd4   : > { %v476_v25 = vmul.f32 %v475_v24, %v473_v23 }
  0xd6   : > { %v477_v26 = vxor.u32 2147483648, %v476_v25 }
  0xd8   : > { %v478_v27 = vsel %vm395_vm8, %v477_v26, %v476_v25 }
  0xd9   : > { %v481_v28 = vsel %vm394_vm9, %v1239_v12, %v478_v27 }
  0xda   : > { %1037 = vcosq.f32 %v481_v28 }
  0xdb   : > { %1039 = vsinq.f32 %v481_v28 }
  0xe7   : > { %v1038_v33 = vpop.eup %1037 }
  0xe8   : > { %v1040_v34 = vpop.eup %1039  ;;  %v492_v35 = vxor.u32 2147483648, %v1038_v33 }
  0xe9   : > { %v489_v36 = vxor.u32 2147483648, %v1040_v34 }
  0xea   : > { %v493_v37 = vsel %vm491_vm10, %v492_v35, %v1040_v34 }
  0xeb   : > { %v490_v38 = vsel %vm488_vm11, %v1038_v33, %v489_v36 }
  0xec   : > { %v494_v14 = vsel %vm487_vm12, %v490_v38, %v493_v37 }
  0xed   : > { %v495_v39 = vsel %vm485_vm13, nan, %v494_v14 }
  0xee   : > { %v500_v40 = vpack.c.bf16 %v495_v39, %v495_v39 }
  0xf0   : > { %965 = vmatprep.subr.msk.bf16.mxu0 %vm542_vm14, %v500_v40  ;;  %v544_v41 = vsel %vm542_vm14, %v500_v40, 0 }
  0xf1   : > { %960 = vmatpush3.bf16.msra.mxu0 %v544_v41 }
  0xf4   : > { %962 = vmatmul.mubr.msk.bf16.vlgmr.msra.gmra.mxu0 %vm535_vm0, %v1036_v42 }
 0x1b4   : > { %v963_v46 = vpop.f32.mrf.mxu0 }
 0x1b5   : > { %v589_v47 = vadd.f32 %v963_v46, %v518_v45 }
 0x1b6   : > { %v580_v12 = vpop.f32.mrf.mxu0 }
 0x1b7   : > { %v581_v48 = vadd.f32 %v580_v12, %v508_v43  ;;  %619 = vadd.xlane.f32.xlu0 %v589_v47  ;;  %v630_v58 = vmul.f32 %v589_v47, %v589_v47 }
 0x1b8   : > { %v964_v50 = vpop.f32.mrf.mxu0 }
 0x1b9   : > { %v592_v51 = vadd.f32 %v964_v50, %v523_v49  ;;  %v628_v52 = vmul.f32 %v581_v48, %v581_v48 }
 0x1ba   : > { %v583_v53 = vpop.f32.mrf.mxu0 }
 0x1bb   : > { %v953_v54 = vpack.c.bf16 %v592_v51, %v589_v47  ;;  %v584_v55 = vadd.f32 %v583_v53, %v513_v44  ;;  %615 = vadd.xlane.f32.xlu0 %v581_v48  ;;  %632 = vadd.xlane.f32.xlu1 %v628_v52  ;;  %v631_v59 = vmul.f32 %v592_v51, %v592_v51 }
 0x1bd   : > { %955 = vst [vmem:[%s1265_s23 + $0x8] sm:$0xff] %v953_v54   ;;  %v948_v56 = vpack.c.bf16 %v584_v55, %v581_v48  ;;  %v629_v57 = vmul.f32 %v584_v55, %v584_v55 }
 0x1bf   : > { %949 = vst [vmem:[%s1265_s23] sm:$0xff] %v948_v56   ;;  %621 = vadd.xlane.f32.xlu0 %v592_v51  ;;  %617 = vadd.xlane.f32.xlu1 %v584_v55 }
 0x1c3   : > { %634 = vadd.xlane.f32.xlu0 %v629_v57  ;;  %636 = vadd.xlane.f32.xlu1 %v630_v58 }
 0x1c4   : > { %v693_v6 = vld [vmem:[%s1265_s23 + $0x8] sm:$0xf] (%p1190_p5)  ;;  %v695_v7 = vld [vmem:[%s1265_s23 + $0xc] sm:$0xf] (%p1190_p5) }
 0x1c5   : > { %694 = vst [vmem:[%s672_s10 + $0x10] sm:$0xf] (%p1190_p5), %v693_v6  ;;  %696 = vst [vmem:[%s672_s10 + $0x18] sm:$0xf] (%p1190_p5), %v695_v7 }
 0x1c6   : > { %v689_v4 = vld [vmem:[%s1265_s23] sm:$0xf] (%p1190_p5)  ;;  %v691_v5 = vld [vmem:[%s1265_s23 + $0x4] sm:$0xf] (%p1190_p5) }
 0x1c7   : > { %638 = vadd.xlane.f32.xlu0 %v631_v59  ;;  %690 = vst [vmem:[%s672_s10] sm:$0xf] (%p1190_p5), %v689_v4  ;;  %692 = vst [vmem:[%s672_s10 + $0x8] sm:$0xf] (%p1190_p5), %v691_v5 }
 0x240   : > { %v620_v60 = vpop.xlane.xlu0 %619 }
 0x241   : > { %626 = vst.msk [vmem:[%s367_s19 + $0x10] sm:$0xff] %vm623_vm15, %v620_v60 }
 0x244   : > { %v616_v61 = vpop.xlane.xlu0 %615  ;;  %v633_v62 = vpop.xlane.xlu1 %632 }
 0x245   : > { %624 = vst.msk [vmem:[%s367_s19] sm:$0xff] %vm623_vm15, %v616_v61  ;;  %640 = vst.msk [vmem:[%s376_s17] sm:$0xff] %vm623_vm15, %v633_v62 }
 0x248   : > { %v622_v63 = vpop.xlane.xlu0 %621  ;;  %v618_v0 = vpop.xlane.xlu1 %617 }
 0x249   : > { %627 = vst.msk [vmem:[%s367_s19 + $0x18] sm:$0xff] %vm623_vm15, %v622_v63  ;;  %625 = vst.msk [vmem:[%s367_s19 + $0x8] sm:$0xff] %vm623_vm15, %v618_v0 }
 0x24c   : > { %v635_v1 = vpop.xlane.xlu0 %634  ;;  %v637_v2 = vpop.xlane.xlu1 %636 }
 0x24d   : > { %641 = vst.msk [vmem:[%s376_s17 + $0x8] sm:$0xff] %vm623_vm15, %v635_v1  ;;  %642 = vst.msk [vmem:[%s376_s17 + $0x10] sm:$0xff] %vm623_vm15, %v637_v2  ;;  %668 = sbr.rel (!%p1190_p5) target bundleno = 594 (0x252), region = 44 }
 0x250   : > { %v639_v3 = vpop.xlane.xlu0 %638 }
 0x251   : > { %643 = vst.msk [vmem:[%s376_s17 + $0x18] sm:$0xff] %vm623_vm15, %v639_v3 }
 0x252 PF: > { %s18_s30 = sadd.s32 1, %s1095_s30   ;;  %s1328_s24 = smov %s1075_s25 }
 0x253   : > { %p15_p11 = scmp.ge.s32.totalorder %s18_s30, 6   ;;  %s1329_s25 = smov %s1201_s16 }
 0x254   : > { %s1330_s26 = smov %s1087_s28  ;;  %s1331_s27 = smov %s1091_s29 }
 0x255   : > { %s1332_s28 = smov %s1335_s8  ;;  %s1333_s29 = smov %s1339_s9 }
 0x256   :  { %17 = sbr.rel (!%p15_p11) target bundleno = 6 (0x6), region = 141 }

</bundles_post_ra>
